<compile_context>
chip_gen: v5e
topology: v5e:2x2
jax: 0.10.0
libtpu: 0.0.40
codegen_flags: <defaults>
</compile_context>

<pallas_src>
import functools

import jax
import jax.numpy as jnp
from jax import lax
from jax.experimental import pallas as pl
from jax.experimental.pallas import tpu as pltpu


def _pick_tile(n, candidates):
    """Largest candidate that divides n (else n itself, i.e. a full block)."""
    for c in candidates:
        if n % c == 0:
            return c
    return n


# ---------------------------------------------------------------------------
# Kernel 1: fused q/k/v/g/k_gate projections (row-tiled, single read of x)
# ---------------------------------------------------------------------------
def _fused_proj_kernel(x_ref, wq_ref, wk_ref, wv_ref, wg_ref, wkg1_ref, wkg2_ref,
                       bg_ref, bkg2_ref,
                       q_ref, k_ref, v_ref, g_ref, kg_ref):
    x = x_ref[...]
    q_ref[...] = jnp.dot(x, wq_ref[...], preferred_element_type=jnp.float32)
    k_ref[...] = jnp.dot(x, wk_ref[...], preferred_element_type=jnp.float32)
    v_ref[...] = jnp.dot(x, wv_ref[...], preferred_element_type=jnp.float32)
    g_ref[...] = (jnp.dot(x, wg_ref[...], preferred_element_type=jnp.float32)
                  + bg_ref[...])
    kg1 = jnp.dot(x, wkg1_ref[...], preferred_element_type=jnp.float32)
    kg_ref[...] = (jnp.dot(kg1, wkg2_ref[...], preferred_element_type=jnp.float32)
                   + bkg2_ref[...])


def fused_projections(x2, params):
    BL, E = x2.shape
    E2 = E // 2
    R = params["w_kg1"].shape[1]        # k_gate bottleneck (16)
    TM = _pick_tile(BL, (512, 256, 128, 64, 32, 16, 8))

    bg = params["b_g"].reshape(1, E).astype(jnp.float32)
    bkg2 = params["b_kg2"].reshape(1, E2).astype(jnp.float32)

    def full(shape):
        return pl.BlockSpec(shape, lambda i, _n=len(shape): (0,) * _n)

    def rows(w):
        return pl.BlockSpec((TM, w), lambda i: (i, 0))

    return pl.pallas_call(
        _fused_proj_kernel,
        grid=(BL // TM,),
        in_specs=[
            rows(E),
            full((E, E2)), full((E, E2)), full((E, E)), full((E, E)),
            full((E, R)), full((R, E2)),
            full((1, E)), full((1, E2)),
        ],
        out_specs=(rows(E2), rows(E2), rows(E), rows(E), rows(E2)),
        out_shape=(
            jax.ShapeDtypeStruct((BL, E2), jnp.float32),
            jax.ShapeDtypeStruct((BL, E2), jnp.float32),
            jax.ShapeDtypeStruct((BL, E), jnp.float32),
            jax.ShapeDtypeStruct((BL, E), jnp.float32),
            jax.ShapeDtypeStruct((BL, E2), jnp.float32),
        ),
        compiler_params=pltpu.CompilerParams(dimension_semantics=("parallel",)),
    )(x2.astype(jnp.float32),
      params["w_q"].astype(jnp.float32), params["w_k"].astype(jnp.float32),
      params["w_v"].astype(jnp.float32), params["w_g"].astype(jnp.float32),
      params["w_kg1"].astype(jnp.float32), params["w_kg2"].astype(jnp.float32),
      bg, bkg2)


# ---------------------------------------------------------------------------
# Kernel 2: chunked GLA recurrence + fused LayerNorm epilogue
# ---------------------------------------------------------------------------
def _gla_chunk_kernel(q_ref, k_ref, v_ref, gk_ref, o_ref, s_ref, state,
                      *, scaling, normalizer, eps):
    # q_ref/k_ref/gk_ref: (C, dk); v_ref/o_ref: (C, dv); s_ref/state: (dk, dv)
    c_idx = pl.program_id(2)

    @pl.when(c_idx == 0)
    def _():
        state[...] = jnp.zeros_like(state)

    C = q_ref.shape[0]

    # Per-step log decay and its inclusive in-chunk cumulative sum.
    gk = jax.nn.log_sigmoid(gk_ref[...]) * (1.0 / normalizer)          # (C, dk)

    row = lax.broadcasted_iota(jnp.int32, (C, C), 0)
    col = lax.broadcasted_iota(jnp.int32, (C, C), 1)
    causal = row >= col                                                # incl. diagonal
    tri = causal.astype(jnp.float32)

    G = jnp.dot(tri, gk, preferred_element_type=jnp.float32)           # cumsum via MXU
    g_last = jnp.sum(gk, axis=0, keepdims=True)                        # (1, dk)

    q = q_ref[...]
    k = k_ref[...] * scaling
    v = v_ref[...]

    q_g = q * jnp.exp(G)                         # q_t scaled by decay since chunk start
    # TODO(synk): for very long chunks with strongly negative gates exp(-G) can
    # overflow fp32; a production kernel adds a secondary sub-chunk level here.
    k_inv = k * jnp.exp(-G)                      # intra-chunk keys
    k_rem = k * jnp.exp(g_last - G)              # keys decayed to chunk end (<= 1)

    # Cross-chunk contribution: decayed q hits the carried state.
    o_inter = jnp.dot(q_g, state[...], preferred_element_type=jnp.float32)   # (C, dv)

    # Intra-chunk contribution: causal decay-weighted attention matrix.
    A = jnp.dot(q_g, k_inv.T, preferred_element_type=jnp.float32)            # (C, C)
    A = jnp.where(causal, A, 0.0)
    o_intra = jnp.dot(A, v, preferred_element_type=jnp.float32)              # (C, dv)

    o = o_inter + o_intra

    # State update, once per chunk:  S <- diag(exp(g_last)) S + k_rem^T @ v
    state[...] = (state[...] * jnp.exp(g_last).T
                  + jnp.dot(k_rem.T, v, preferred_element_type=jnp.float32))
    s_ref[...] = state[...]      # resident output block; last write is the final state

    # Fused LayerNorm over head_dim (eps=1e-5, no affine).
    mu = jnp.mean(o, axis=-1, keepdims=True)
    var = jnp.mean((o - mu) ** 2, axis=-1, keepdims=True)
    o_ref[...] = (o - mu) * lax.rsqrt(var + eps)


# ---------------------------------------------------------------------------
# Kernel 3: silu(g) * o gating fused with the output projection (row-tiled)
# ---------------------------------------------------------------------------
def _gated_out_kernel(g_ref, o_ref, w_ref, out_ref):
    gated = jax.nn.silu(g_ref[...]) * o_ref[...]
    out_ref[...] = jnp.dot(gated, w_ref[...], preferred_element_type=jnp.float32)


def gated_out_proj(g, o_flat, w_out):
    BL, E = g.shape
    TM = _pick_tile(BL, (512, 256, 128, 64, 32, 16, 8))
    return pl.pallas_call(
        _gated_out_kernel,
        grid=(BL // TM,),
        in_specs=[pl.BlockSpec((TM, E), lambda i: (i, 0)),
                  pl.BlockSpec((TM, E), lambda i: (i, 0)),
                  pl.BlockSpec((E, E), lambda i: (0, 0))],
        out_specs=pl.BlockSpec((TM, E), lambda i: (i, 0)),
        out_shape=jax.ShapeDtypeStruct((BL, E), jnp.float32),
        compiler_params=pltpu.CompilerParams(dimension_semantics=("parallel",)),
    )(g, o_flat, w_out.astype(jnp.float32))


# ---------------------------------------------------------------------------
# Forward pass
# ---------------------------------------------------------------------------
def gla_forward(params, x, num_heads, normalizer=16.0, chunk_size=None):
    B, L, E = x.shape
    H = num_heads
    E2 = E // 2
    dk = E2 // H                 # per-head q/k dim
    dv = E // H                  # per-head v dim (= head_dim)
    scaling = float(dv) ** -0.5  # (embed_dim // num_heads) ** -0.5

    x2 = x.reshape(B * L, E)
    q, k, v, g, kg = fused_projections(x2, params)

    # TODO(synk): head split/merge still runs as XLA transposes outside the kernels;
    # folding them into the GLA BlockSpecs needs an (L, H*d) lane-packed layout variant.
    def to_heads(t, d):
        return t.reshape(B, L, H, d).transpose(0, 2, 1, 3)

    qh, kh, vh, kgh = to_heads(q, dk), to_heads(k, dk), to_heads(v, dv), to_heads(kg, dk)

    if chunk_size is not None and L % chunk_size == 0:
        C = chunk_size
    else:
        C = _pick_tile(L, (256, 128, 64, 32, 16, 8))
    NC = L // C

    kernel = functools.partial(_gla_chunk_kernel, scaling=scaling,
                               normalizer=float(normalizer), eps=1e-5)
    o, final_state = pl.pallas_call(
        kernel,
        grid=(B, H, NC),
        in_specs=[
            pl.BlockSpec((None, None, C, dk), lambda b, h, c: (b, h, c, 0)),
            pl.BlockSpec((None, None, C, dk), lambda b, h, c: (b, h, c, 0)),
            pl.BlockSpec((None, None, C, dv), lambda b, h, c: (b, h, c, 0)),
            pl.BlockSpec((None, None, C, dk), lambda b, h, c: (b, h, c, 0)),
        ],
        out_specs=(
            pl.BlockSpec((None, None, C, dv), lambda b, h, c: (b, h, c, 0)),
            pl.BlockSpec((None, None, dk, dv), lambda b, h, c: (b, h, 0, 0)),
        ),
        out_shape=(
            jax.ShapeDtypeStruct((B, H, L, dv), jnp.float32),
            jax.ShapeDtypeStruct((B, H, dk, dv), jnp.float32),
        ),
        scratch_shapes=[pltpu.VMEM((dk, dv), jnp.float32)],   # recurrent state carry
        compiler_params=pltpu.CompilerParams(
            dimension_semantics=("parallel", "parallel", "arbitrary")),
    )(qh, kh, vh, kgh)

    o_flat = o.transpose(0, 2, 1, 3).reshape(B * L, E)
    out = gated_out_proj(g, o_flat, params["w_out"])
    return out.reshape(B, L, E), final_state


# ---------------------------------------------------------------------------
# Pure-JAX reference (sequential recurrence, for correctness check)
# ---------------------------------------------------------------------------
def reference_forward(params, x, num_heads, normalizer=16.0):
    B, L, E = x.shape
    H = num_heads
    dk = (E // 2) // H
    dv = E // H
    scaling = float(dv) ** -0.5

    q = x @ params["w_q"]
    k = (x @ params["w_k"]) * scaling
    kg = (x @ params["w_kg1"]) @ params["w_kg2"] + params["b_kg2"]
    v = x @ params["w_v"]
    g = x @ params["w_g"] + params["b_g"]

    def to_heads(t, dim):
        return t.reshape(B, L, H, dim).transpose(0, 2, 1, 3)

    qh, kh, kgh, vh = to_heads(q, dk), to_heads(k, dk), to_heads(kg, dk), to_heads(v, dv)
    gk = jax.nn.log_sigmoid(kgh) / normalizer

    def step(state, inp):
        q_t, k_t, v_t, gk_t = inp
        state = state * jnp.exp(gk_t)[..., None] + k_t[..., None] * v_t[..., None, :]
        o_t = jnp.einsum("bhk,bhkv->bhv", q_t, state)
        return state, o_t

    init = jnp.zeros((B, H, dk, dv), jnp.float32)
    inputs = tuple(jnp.moveaxis(t, 2, 0) for t in (qh, kh, vh, gk))
    final_state, o = lax.scan(step, init, inputs)
    o = jnp.moveaxis(o, 0, 2)  # (B, H, L, dv)

    mu = o.mean(-1, keepdims=True)
    var = ((o - mu) ** 2).mean(-1, keepdims=True)
    o = (o - mu) / jnp.sqrt(var + 1e-5)

    o = o.transpose(0, 2, 1, 3).reshape(B, L, E)
    out = (jax.nn.silu(g) * o) @ params["w_out"]
    return out, final_state


# ---------------------------------------------------------------------------
# Deterministic parameter init (shapes from the module's __init__)
# ---------------------------------------------------------------------------
def xavier_uniform(key, shape, gain=1.0):
    fan_in, fan_out = shape
    a = gain * (6.0 / (fan_in + fan_out)) ** 0.5
    return jax.random.uniform(key, shape, jnp.float32, -a, a)


def default_linear_weight(key, shape):
    bound = 1.0 / (shape[0] ** 0.5)
    return jax.random.uniform(key, shape, jnp.float32, -bound, bound)


def default_bias(key, n, fan_in):
    bound = 1.0 / (fan_in ** 0.5)
    return jax.random.uniform(key, (n,), jnp.float32, -bound, bound)


if __name__ == "__main__":
    # small version of the default config (d=128, h=16): d=32, h=4 -> embed_dim=128
    d, h = 32, 4
    E = d * h            # embed_dim = 128
    B, L = 2, 16
    gain = 2.0 ** -2.5

    ks = jax.random.split(jax.random.PRNGKey(0), 11)
    params = {
        "w_q":   xavier_uniform(ks[0], (E, E // 2), gain),
        "w_k":   xavier_uniform(ks[1], (E, E // 2), gain),
        "w_kg1": xavier_uniform(ks[2], (E, 16), gain),
        "w_kg2": xavier_uniform(ks[3], (16, E // 2), gain),
        "b_kg2": default_bias(ks[4], E // 2, 16),
        "w_v":   default_linear_weight(ks[5], (E, E)),
        "w_g":   default_linear_weight(ks[6], (E, E)),
        "b_g":   default_bias(ks[7], E, E),
        "w_out": default_linear_weight(ks[8], (E, E)),
    }
    x = jax.random.normal(ks[9], (B, L, E), jnp.float32)

    # chunk_size=8 with L=16 exercises the cross-chunk state carry (2 chunks).
    fwd = jax.jit(functools.partial(gla_forward, num_heads=h, chunk_size=8))
    out, hidden = fwd(params, x)
    out = jax.block_until_ready(out)
    hidden = jax.block_until_ready(hidden)

    ref_out, ref_hidden = reference_forward(params, x, num_heads=h)
    assert jnp.allclose(out, ref_out, rtol=1e-2, atol=1e-3), float(
        jnp.max(jnp.abs(out - ref_out))
    )
    assert jnp.allclose(hidden, ref_hidden, rtol=1e-2, atol=1e-3), float(
        jnp.max(jnp.abs(hidden - ref_hidden))
    )
    print("KERNEL_OK")
</pallas_src>

<mosaic_0001>
module attributes {stable_mosaic.version = 11 : i64} {
  func.func @_fused_proj_kernel(%arg0: i32, %arg1: memref<32x128xf32, #tpu.memory_space<vmem>>, %arg2: memref<128x64xf32, #tpu.memory_space<vmem>>, %arg3: memref<128x64xf32, #tpu.memory_space<vmem>>, %arg4: memref<128x128xf32, #tpu.memory_space<vmem>>, %arg5: memref<128x128xf32, #tpu.memory_space<vmem>>, %arg6: memref<128x16xf32, #tpu.memory_space<vmem>>, %arg7: memref<16x64xf32, #tpu.memory_space<vmem>>, %arg8: memref<1x128xf32, #tpu.memory_space<vmem>>, %arg9: memref<1x64xf32, #tpu.memory_space<vmem>>, %arg10: memref<32x64xf32, #tpu.memory_space<vmem>>, %arg11: memref<32x64xf32, #tpu.memory_space<vmem>>, %arg12: memref<32x128xf32, #tpu.memory_space<vmem>>, %arg13: memref<32x128xf32, #tpu.memory_space<vmem>>, %arg14: memref<32x64xf32, #tpu.memory_space<vmem>>) attributes {dimension_semantics = [#tpu.dimension_semantics<parallel>], iteration_bounds = array<i64: 1>, scalar_prefetch = 0 : i64, scratch_operands = 0 : i64, tpu.core_type = #tpu.core_type<tc>, window_params = [{transform_indices = @transform_0, window_bounds = array<i64: 32, 128>}, {pipeline_mode = #tpu.pipeline_mode<synchronous>, transform_indices = @transform_1, window_bounds = array<i64: 128, 64>}, {pipeline_mode = #tpu.pipeline_mode<synchronous>, transform_indices = @transform_2, window_bounds = array<i64: 128, 64>}, {pipeline_mode = #tpu.pipeline_mode<synchronous>, transform_indices = @transform_3, window_bounds = array<i64: 128, 128>}, {pipeline_mode = #tpu.pipeline_mode<synchronous>, transform_indices = @transform_4, window_bounds = array<i64: 128, 128>}, {pipeline_mode = #tpu.pipeline_mode<synchronous>, transform_indices = @transform_5, window_bounds = array<i64: 128, 16>}, {pipeline_mode = #tpu.pipeline_mode<synchronous>, transform_indices = @transform_6, window_bounds = array<i64: 16, 64>}, {pipeline_mode = #tpu.pipeline_mode<synchronous>, transform_indices = @transform_7, window_bounds = array<i64: 1, 128>}, {pipeline_mode = #tpu.pipeline_mode<synchronous>, transform_indices = @transform_8, window_bounds = array<i64: 1, 64>}, {transform_indices = @transform_9, window_bounds = array<i64: 32, 64>}, {transform_indices = @transform_10, window_bounds = array<i64: 32, 64>}, {transform_indices = @transform_11, window_bounds = array<i64: 32, 128>}, {transform_indices = @transform_12, window_bounds = array<i64: 32, 128>}, {transform_indices = @transform_13, window_bounds = array<i64: 32, 64>}]} {
    %c0 = arith.constant 0 : index
    %c0_0 = arith.constant 0 : index
    %0 = vector.load %arg1[%c0, %c0_0] : memref<32x128xf32, #tpu.memory_space<vmem>>, vector<32x128xf32>
    %c0_1 = arith.constant 0 : index
    %c0_2 = arith.constant 0 : index
    %1 = vector.load %arg2[%c0_1, %c0_2] : memref<128x64xf32, #tpu.memory_space<vmem>>, vector<128x64xf32>
    %cst = arith.constant dense<0.000000e+00> : vector<32x64xf32>
    %2 = tpu.matmul %0, %1, %cst {dimension_numbers = #tpu.dot_dimension_numbers<[1], [0], [0], [1], [0, 0, 1, 1], [], []>} : vector<32x128xf32>, vector<128x64xf32>, vector<32x64xf32> -> vector<32x64xf32>
    %c0_3 = arith.constant 0 : index
    %c0_4 = arith.constant 0 : index
    %3 = vector.load %arg10[%c0_3, %c0_4] : memref<32x64xf32, #tpu.memory_space<vmem>>, vector<32x64xf32>
    tpu.vector_store %arg10[%c0_3, %c0_4], %2 {strides = array<i32>} : memref<32x64xf32, #tpu.memory_space<vmem>>, vector<32x64xf32>,
    %c0_5 = arith.constant 0 : index
    %c0_6 = arith.constant 0 : index
    %4 = vector.load %arg3[%c0_5, %c0_6] : memref<128x64xf32, #tpu.memory_space<vmem>>, vector<128x64xf32>
    %cst_7 = arith.constant dense<0.000000e+00> : vector<32x64xf32>
    %5 = tpu.matmul %0, %4, %cst_7 {dimension_numbers = #tpu.dot_dimension_numbers<[1], [0], [0], [1], [0, 0, 1, 1], [], []>} : vector<32x128xf32>, vector<128x64xf32>, vector<32x64xf32> -> vector<32x64xf32>
    %c0_8 = arith.constant 0 : index
    %c0_9 = arith.constant 0 : index
    %6 = vector.load %arg11[%c0_8, %c0_9] : memref<32x64xf32, #tpu.memory_space<vmem>>, vector<32x64xf32>
    tpu.vector_store %arg11[%c0_8, %c0_9], %5 {strides = array<i32>} : memref<32x64xf32, #tpu.memory_space<vmem>>, vector<32x64xf32>,
    %c0_10 = arith.constant 0 : index
    %c0_11 = arith.constant 0 : index
    %7 = vector.load %arg4[%c0_10, %c0_11] : memref<128x128xf32, #tpu.memory_space<vmem>>, vector<128x128xf32>
    %cst_12 = arith.constant dense<0.000000e+00> : vector<32x128xf32>
    %8 = tpu.matmul %0, %7, %cst_12 {dimension_numbers = #tpu.dot_dimension_numbers<[1], [0], [0], [1], [0, 0, 1, 1], [], []>} : vector<32x128xf32>, vector<128x128xf32>, vector<32x128xf32> -> vector<32x128xf32>
    %c0_13 = arith.constant 0 : index
    %c0_14 = arith.constant 0 : index
    %9 = vector.load %arg12[%c0_13, %c0_14] : memref<32x128xf32, #tpu.memory_space<vmem>>, vector<32x128xf32>
    tpu.vector_store %arg12[%c0_13, %c0_14], %8 {strides = array<i32>} : memref<32x128xf32, #tpu.memory_space<vmem>>, vector<32x128xf32>,
    %c0_15 = arith.constant 0 : index
    %c0_16 = arith.constant 0 : index
    %10 = vector.load %arg5[%c0_15, %c0_16] : memref<128x128xf32, #tpu.memory_space<vmem>>, vector<128x128xf32>
    %cst_17 = arith.constant dense<0.000000e+00> : vector<32x128xf32>
    %11 = tpu.matmul %0, %10, %cst_17 {dimension_numbers = #tpu.dot_dimension_numbers<[1], [0], [0], [1], [0, 0, 1, 1], [], []>} : vector<32x128xf32>, vector<128x128xf32>, vector<32x128xf32> -> vector<32x128xf32>
    %c0_18 = arith.constant 0 : index
    %c0_19 = arith.constant 0 : index
    %12 = vector.load %arg8[%c0_18, %c0_19] : memref<1x128xf32, #tpu.memory_space<vmem>>, vector<1x128xf32>
    %13 = vector.broadcast %12 : vector<1x128xf32> to vector<32x128xf32>
    %14 = arith.addf %11, %13 : vector<32x128xf32>
    %c0_20 = arith.constant 0 : index
    %c0_21 = arith.constant 0 : index
    %15 = vector.load %arg13[%c0_20, %c0_21] : memref<32x128xf32, #tpu.memory_space<vmem>>, vector<32x128xf32>
    tpu.vector_store %arg13[%c0_20, %c0_21], %14 {strides = array<i32>} : memref<32x128xf32, #tpu.memory_space<vmem>>, vector<32x128xf32>,
    %c0_22 = arith.constant 0 : index
    %c0_23 = arith.constant 0 : index
    %16 = vector.load %arg6[%c0_22, %c0_23] : memref<128x16xf32, #tpu.memory_space<vmem>>, vector<128x16xf32>
    %cst_24 = arith.constant dense<0.000000e+00> : vector<32x16xf32>
    %17 = tpu.matmul %0, %16, %cst_24 {dimension_numbers = #tpu.dot_dimension_numbers<[1], [0], [0], [1], [0, 0, 1, 1], [], []>} : vector<32x128xf32>, vector<128x16xf32>, vector<32x16xf32> -> vector<32x16xf32>
    %c0_25 = arith.constant 0 : index
    %c0_26 = arith.constant 0 : index
    %18 = vector.load %arg7[%c0_25, %c0_26] : memref<16x64xf32, #tpu.memory_space<vmem>>, vector<16x64xf32>
    %cst_27 = arith.constant dense<0.000000e+00> : vector<32x64xf32>
    %19 = tpu.matmul %17, %18, %cst_27 {dimension_numbers = #tpu.dot_dimension_numbers<[1], [0], [0], [1], [0, 0, 1, 1], [], []>} : vector<32x16xf32>, vector<16x64xf32>, vector<32x64xf32> -> vector<32x64xf32>
    %c0_28 = arith.constant 0 : index
    %c0_29 = arith.constant 0 : index
    %20 = vector.load %arg9[%c0_28, %c0_29] : memref<1x64xf32, #tpu.memory_space<vmem>>, vector<1x64xf32>
    %21 = vector.broadcast %20 : vector<1x64xf32> to vector<32x64xf32>
    %22 = arith.addf %19, %21 : vector<32x64xf32>
    %c0_30 = arith.constant 0 : index
    %c0_31 = arith.constant 0 : index
    %23 = vector.load %arg14[%c0_30, %c0_31] : memref<32x64xf32, #tpu.memory_space<vmem>>, vector<32x64xf32>
    tpu.vector_store %arg14[%c0_30, %c0_31], %22 {strides = array<i32>} : memref<32x64xf32, #tpu.memory_space<vmem>>, vector<32x64xf32>,
    return
  }
  func.func @transform_0(%arg0: i32) -> (i32, i32) {
    %c0_i32 = arith.constant 0 : i32
    %c0_i32_0 = arith.constant 0 : i32
    return %arg0, %c0_i32 : i32, i32
  }
  func.func @transform_1(%arg0: i32) -> (i32, i32) {
    %c0_i32 = arith.constant 0 : i32
    %c0_i32_0 = arith.constant 0 : i32
    %c0_i32_1 = arith.constant 0 : i32
    return %c0_i32, %c0_i32_0 : i32, i32
  }
  func.func @transform_2(%arg0: i32) -> (i32, i32) {
    %c0_i32 = arith.constant 0 : i32
    %c0_i32_0 = arith.constant 0 : i32
    %c0_i32_1 = arith.constant 0 : i32
    return %c0_i32, %c0_i32_0 : i32, i32
  }
  func.func @transform_3(%arg0: i32) -> (i32, i32) {
    %c0_i32 = arith.constant 0 : i32
    %c0_i32_0 = arith.constant 0 : i32
    %c0_i32_1 = arith.constant 0 : i32
    return %c0_i32, %c0_i32_0 : i32, i32
  }
  func.func @transform_4(%arg0: i32) -> (i32, i32) {
    %c0_i32 = arith.constant 0 : i32
    %c0_i32_0 = arith.constant 0 : i32
    %c0_i32_1 = arith.constant 0 : i32
    return %c0_i32, %c0_i32_0 : i32, i32
  }
  func.func @transform_5(%arg0: i32) -> (i32, i32) {
    %c0_i32 = arith.constant 0 : i32
    %c0_i32_0 = arith.constant 0 : i32
    %c0_i32_1 = arith.constant 0 : i32
    return %c0_i32, %c0_i32_0 : i32, i32
  }
  func.func @transform_6(%arg0: i32) -> (i32, i32) {
    %c0_i32 = arith.constant 0 : i32
    %c0_i32_0 = arith.constant 0 : i32
    %c0_i32_1 = arith.constant 0 : i32
    return %c0_i32, %c0_i32_0 : i32, i32
  }
  func.func @transform_7(%arg0: i32) -> (i32, i32) {
    %c0_i32 = arith.constant 0 : i32
    %c0_i32_0 = arith.constant 0 : i32
    %c0_i32_1 = arith.constant 0 : i32
    return %c0_i32, %c0_i32_0 : i32, i32
  }
  func.func @transform_8(%arg0: i32) -> (i32, i32) {
    %c0_i32 = arith.constant 0 : i32
    %c0_i32_0 = arith.constant 0 : i32
    %c0_i32_1 = arith.constant 0 : i32
    return %c0_i32, %c0_i32_0 : i32, i32
  }
  func.func @transform_9(%arg0: i32) -> (i32, i32) {
    %c0_i32 = arith.constant 0 : i32
    %c0_i32_0 = arith.constant 0 : i32
    return %arg0, %c0_i32 : i32, i32
  }
  func.func @transform_10(%arg0: i32) -> (i32, i32) {
    %c0_i32 = arith.constant 0 : i32
    %c0_i32_0 = arith.constant 0 : i32
    return %arg0, %c0_i32 : i32, i32
  }
  func.func @transform_11(%arg0: i32) -> (i32, i32) {
    %c0_i32 = arith.constant 0 : i32
    %c0_i32_0 = arith.constant 0 : i32
    return %arg0, %c0_i32 : i32, i32
  }
  func.func @transform_12(%arg0: i32) -> (i32, i32) {
    %c0_i32 = arith.constant 0 : i32
    %c0_i32_0 = arith.constant 0 : i32
    return %arg0, %c0_i32 : i32, i32
  }
  func.func @transform_13(%arg0: i32) -> (i32, i32) {
    %c0_i32 = arith.constant 0 : i32
    %c0_i32_0 = arith.constant 0 : i32
    return %arg0, %c0_i32 : i32, i32
  }
}

module attributes {stable_mosaic.version = 11 : i64} {
  func.func @_gla_chunk_kernel(%arg0: i32, %arg1: i32, %arg2: i32, %arg3: memref<1x1x8x16xf32, #tpu.memory_space<vmem>>, %arg4: memref<1x1x8x16xf32, #tpu.memory_space<vmem>>, %arg5: memref<1x1x8x32xf32, #tpu.memory_space<vmem>>, %arg6: memref<1x1x8x16xf32, #tpu.memory_space<vmem>>, %arg7: memref<1x1x8x32xf32, #tpu.memory_space<vmem>>, %arg8: memref<1x1x16x32xf32, #tpu.memory_space<vmem>>, %arg9: memref<16x32xf32, #tpu.memory_space<vmem>>) attributes {dimension_semantics = [#tpu.dimension_semantics<parallel>, #tpu.dimension_semantics<parallel>, #tpu.dimension_semantics<arbitrary>], iteration_bounds = array<i64: 2, 4, 2>, scalar_prefetch = 0 : i64, scratch_operands = 1 : i64, tpu.core_type = #tpu.core_type<tc>, window_params = [{transform_indices = @transform_0, window_bounds = array<i64: 1, 1, 8, 16>}, {transform_indices = @transform_1, window_bounds = array<i64: 1, 1, 8, 16>}, {transform_indices = @transform_2, window_bounds = array<i64: 1, 1, 8, 32>}, {transform_indices = @transform_3, window_bounds = array<i64: 1, 1, 8, 16>}, {transform_indices = @transform_4, window_bounds = array<i64: 1, 1, 8, 32>}, {transform_indices = @transform_5, window_bounds = array<i64: 1, 1, 16, 32>}]} {
    %c0_i32 = arith.constant 0 : i32
    %0 = arith.cmpi eq, %arg2, %c0_i32 : i32
    %1 = arith.extui %0 : i1 to i32
    %c0_i32_0 = arith.constant 0 : i32
    %2 = arith.cmpi ne, %1, %c0_i32_0 : i32
    scf.if %2 {
      %cst_50 = arith.constant 0.000000e+00 : f32
      %93 = vector.broadcast %cst_50 : f32 to vector<16x32xf32>
      %c0_51 = arith.constant 0 : index
      %c0_52 = arith.constant 0 : index
      %94 = vector.load %arg9[%c0_51, %c0_52] : memref<16x32xf32, #tpu.memory_space<vmem>>, vector<16x32xf32>
      tpu.vector_store %arg9[%c0_51, %c0_52], %93 {strides = array<i32>} : memref<16x32xf32, #tpu.memory_space<vmem>>, vector<16x32xf32>,
    } else {
    }
    %c0 = arith.constant 0 : index
    %c0_1 = arith.constant 0 : index
    %c0_2 = arith.constant 0 : index
    %c0_3 = arith.constant 0 : index
    %3 = vector.load %arg6[%c0, %c0_1, %c0_2, %c0_3] : memref<1x1x8x16xf32, #tpu.memory_space<vmem>>, vector<1x1x8x16xf32>
    %4 = vector.shape_cast %3 : vector<1x1x8x16xf32> to vector<8x16xf32>
    %cst = arith.constant 0.000000e+00 : f32
    %5 = vector.broadcast %cst : f32 to vector<8x16xf32>
    %6 = arith.subf %5, %4 : vector<8x16xf32>
    %cst_4 = arith.constant 0.000000e+00 : f32
    %7 = vector.broadcast %cst_4 : f32 to vector<8x16xf32>
    %8 = arith.maximumf %6, %7 : vector<8x16xf32>
    %9 = vector.broadcast %cst_4 : f32 to vector<8x16xf32>
    %10 = arith.subf %6, %9 : vector<8x16xf32>
    %11 = arith.cmpf one, %10, %10 : vector<8x16xf32>
    %12 = vector.broadcast %cst_4 : f32 to vector<8x16xf32>
    %13 = arith.addf %6, %12 : vector<8x16xf32>
    %14 = math.absf %10 : vector<8x16xf32>
    %cst_5 = arith.constant 0.000000e+00 : f32
    %15 = vector.broadcast %cst_5 : f32 to vector<8x16xf32>
    %16 = arith.subf %15, %14 : vector<8x16xf32>
    %17 = math.exp %16 : vector<8x16xf32>
    %18 = math.log1p %17 : vector<8x16xf32>
    %19 = arith.addf %8, %18 : vector<8x16xf32>
    %20 = arith.select %11, %13, %19 : vector<8x16xi1>, vector<8x16xf32>
    %cst_6 = arith.constant 0.000000e+00 : f32
    %21 = vector.broadcast %cst_6 : f32 to vector<8x16xf32>
    %22 = arith.subf %21, %20 : vector<8x16xf32>
    %cst_7 = arith.constant 6.250000e-02 : f32
    %23 = vector.broadcast %cst_7 : f32 to vector<8x16xf32>
    %24 = arith.mulf %22, %23 : vector<8x16xf32>
    %25 = tpu.iota {dimensions = array<i32: 0>} : vector<8x8xi32>
    %26 = tpu.iota {dimensions = array<i32: 1>} : vector<8x8xi32>
    %27 = arith.cmpi sge, %25, %26 : vector<8x8xi32>
    %28 = arith.extui %27 : vector<8x8xi1> to vector<8x8xi32>
    %29 = arith.sitofp %28 : vector<8x8xi32> to vector<8x8xf32>
    %cst_8 = arith.constant dense<0.000000e+00> : vector<8x16xf32>
    %30 = tpu.matmul %29, %24, %cst_8 {dimension_numbers = #tpu.dot_dimension_numbers<[1], [0], [0], [1], [0, 0, 1, 1], [], []>} : vector<8x8xf32>, vector<8x16xf32>, vector<8x16xf32> -> vector<8x16xf32>
    %cst_9 = arith.constant dense<0.000000e+00> : vector<16xf32>
    %31 = vector.multi_reduction <add>, %24, %cst_9 [0] : vector<8x16xf32> to vector<16xf32>
    %32 = vector.shape_cast %31 : vector<16xf32> to vector<1x16xf32>
    %c0_10 = arith.constant 0 : index
    %c0_11 = arith.constant 0 : index
    %c0_12 = arith.constant 0 : index
    %c0_13 = arith.constant 0 : index
    %33 = vector.load %arg3[%c0_10, %c0_11, %c0_12, %c0_13] : memref<1x1x8x16xf32, #tpu.memory_space<vmem>>, vector<1x1x8x16xf32>
    %34 = vector.shape_cast %33 : vector<1x1x8x16xf32> to vector<8x16xf32>
    %c0_14 = arith.constant 0 : index
    %c0_15 = arith.constant 0 : index
    %c0_16 = arith.constant 0 : index
    %c0_17 = arith.constant 0 : index
    %35 = vector.load %arg4[%c0_14, %c0_15, %c0_16, %c0_17] : memref<1x1x8x16xf32, #tpu.memory_space<vmem>>, vector<1x1x8x16xf32>
    %36 = vector.shape_cast %35 : vector<1x1x8x16xf32> to vector<8x16xf32>
    %cst_18 = arith.constant 0.176776692 : f32
    %37 = vector.broadcast %cst_18 : f32 to vector<8x16xf32>
    %38 = arith.mulf %36, %37 : vector<8x16xf32>
    %c0_19 = arith.constant 0 : index
    %c0_20 = arith.constant 0 : index
    %c0_21 = arith.constant 0 : index
    %c0_22 = arith.constant 0 : index
    %39 = vector.load %arg5[%c0_19, %c0_20, %c0_21, %c0_22] : memref<1x1x8x32xf32, #tpu.memory_space<vmem>>, vector<1x1x8x32xf32>
    %40 = vector.shape_cast %39 : vector<1x1x8x32xf32> to vector<8x32xf32>
    %41 = math.exp %30 : vector<8x16xf32>
    %42 = arith.mulf %34, %41 : vector<8x16xf32>
    %cst_23 = arith.constant 0.000000e+00 : f32
    %43 = vector.broadcast %cst_23 : f32 to vector<8x16xf32>
    %44 = arith.subf %43, %30 : vector<8x16xf32>
    %45 = math.exp %44 : vector<8x16xf32>
    %46 = arith.mulf %38, %45 : vector<8x16xf32>
    %47 = vector.broadcast %32 : vector<1x16xf32> to vector<8x16xf32>
    %48 = arith.subf %47, %30 : vector<8x16xf32>
    %49 = math.exp %48 : vector<8x16xf32>
    %50 = arith.mulf %38, %49 : vector<8x16xf32>
    %c0_24 = arith.constant 0 : index
    %c0_25 = arith.constant 0 : index
    %51 = vector.load %arg9[%c0_24, %c0_25] : memref<16x32xf32, #tpu.memory_space<vmem>>, vector<16x32xf32>
    %cst_26 = arith.constant dense<0.000000e+00> : vector<8x32xf32>
    %52 = tpu.matmul %42, %51, %cst_26 {dimension_numbers = #tpu.dot_dimension_numbers<[1], [0], [0], [1], [0, 0, 1, 1], [], []>} : vector<8x16xf32>, vector<16x32xf32>, vector<8x32xf32> -> vector<8x32xf32>
    %53 = tpu.transpose %46, [1, 0] : vector<8x16xf32> -> vector<16x8xf32>
    %cst_27 = arith.constant dense<0.000000e+00> : vector<8x8xf32>
    %54 = tpu.matmul %42, %53, %cst_27 {dimension_numbers = #tpu.dot_dimension_numbers<[1], [0], [0], [1], [0, 0, 1, 1], [], []>} : vector<8x16xf32>, vector<16x8xf32>, vector<8x8xf32> -> vector<8x8xf32>
    %cst_28 = arith.constant 0.000000e+00 : f32
    %55 = vector.broadcast %cst_28 : f32 to vector<8x8xf32>
    %56 = arith.select %27, %54, %55 : vector<8x8xi1>, vector<8x8xf32>
    %cst_29 = arith.constant dense<0.000000e+00> : vector<8x32xf32>
    %57 = tpu.matmul %56, %40, %cst_29 {dimension_numbers = #tpu.dot_dimension_numbers<[1], [0], [0], [1], [0, 0, 1, 1], [], []>} : vector<8x8xf32>, vector<8x32xf32>, vector<8x32xf32> -> vector<8x32xf32>
    %58 = arith.addf %52, %57 : vector<8x32xf32>
    %c0_30 = arith.constant 0 : index
    %c0_31 = arith.constant 0 : index
    %59 = vector.load %arg9[%c0_30, %c0_31] : memref<16x32xf32, #tpu.memory_space<vmem>>, vector<16x32xf32>
    %60 = math.exp %32 : vector<1x16xf32>
    %61 = tpu.transpose %60, [1, 0] : vector<1x16xf32> -> vector<16x1xf32>
    %62 = vector.broadcast %61 : vector<16x1xf32> to vector<16x32xf32>
    %63 = arith.mulf %59, %62 : vector<16x32xf32>
    %64 = tpu.transpose %50, [1, 0] : vector<8x16xf32> -> vector<16x8xf32>
    %cst_32 = arith.constant dense<0.000000e+00> : vector<16x32xf32>
    %65 = tpu.matmul %64, %40, %cst_32 {dimension_numbers = #tpu.dot_dimension_numbers<[1], [0], [0], [1], [0, 0, 1, 1], [], []>} : vector<16x8xf32>, vector<8x32xf32>, vector<16x32xf32> -> vector<16x32xf32>
    %66 = arith.addf %63, %65 : vector<16x32xf32>
    %c0_33 = arith.constant 0 : index
    %c0_34 = arith.constant 0 : index
    %67 = vector.load %arg9[%c0_33, %c0_34] : memref<16x32xf32, #tpu.memory_space<vmem>>, vector<16x32xf32>
    tpu.vector_store %arg9[%c0_33, %c0_34], %66 {strides = array<i32>} : memref<16x32xf32, #tpu.memory_space<vmem>>, vector<16x32xf32>,
    %c0_35 = arith.constant 0 : index
    %c0_36 = arith.constant 0 : index
    %68 = vector.load %arg9[%c0_35, %c0_36] : memref<16x32xf32, #tpu.memory_space<vmem>>, vector<16x32xf32>
    %c0_37 = arith.constant 0 : index
    %c0_38 = arith.constant 0 : index
    %c0_39 = arith.constant 0 : index
    %c0_40 = arith.constant 0 : index
    %69 = vector.load %arg8[%c0_37, %c0_38, %c0_39, %c0_40] : memref<1x1x16x32xf32, #tpu.memory_space<vmem>>, vector<1x1x16x32xf32>
    %70 = vector.shape_cast %69 : vector<1x1x16x32xf32> to vector<16x32xf32>
    %71 = vector.shape_cast %68 : vector<16x32xf32> to vector<1x1x16x32xf32>
    tpu.vector_store %arg8[%c0_37, %c0_38, %c0_39, %c0_40], %71 {strides = array<i32>} : memref<1x1x16x32xf32, #tpu.memory_space<vmem>>, vector<1x1x16x32xf32>,
    %cst_41 = arith.constant dense<0.000000e+00> : vector<8xf32>
    %72 = vector.multi_reduction <add>, %58, %cst_41 [1] : vector<8x32xf32> to vector<8xf32>
    %73 = vector.shape_cast %72 : vector<8xf32> to vector<8x1xf32>
    %cst_42 = arith.constant 3.200000e+01 : f32
    %74 = vector.broadcast %cst_42 : f32 to vector<8x1xf32>
    %75 = arith.divf %73, %74 : vector<8x1xf32>
    %76 = vector.broadcast %75 : vector<8x1xf32> to vector<8x32xf32>
    %77 = arith.subf %58, %76 : vector<8x32xf32>
    %78 = arith.mulf %77, %77 : vector<8x32xf32>
    %cst_43 = arith.constant dense<0.000000e+00> : vector<8xf32>
    %79 = vector.multi_reduction <add>, %78, %cst_43 [1] : vector<8x32xf32> to vector<8xf32>
    %80 = vector.shape_cast %79 : vector<8xf32> to vector<8x1xf32>
    %cst_44 = arith.constant 3.200000e+01 : f32
    %81 = vector.broadcast %cst_44 : f32 to vector<8x1xf32>
    %82 = arith.divf %80, %81 : vector<8x1xf32>
    %83 = vector.broadcast %75 : vector<8x1xf32> to vector<8x32xf32>
    %84 = arith.subf %58, %83 : vector<8x32xf32>
    %cst_45 = arith.constant 9.99999974E-6 : f32
    %85 = vector.broadcast %cst_45 : f32 to vector<8x1xf32>
    %86 = arith.addf %82, %85 : vector<8x1xf32>
    %87 = math.rsqrt %86 : vector<8x1xf32>
    %88 = vector.broadcast %87 : vector<8x1xf32> to vector<8x32xf32>
    %89 = arith.mulf %84, %88 : vector<8x32xf32>
    %c0_46 = arith.constant 0 : index
    %c0_47 = arith.constant 0 : index
    %c0_48 = arith.constant 0 : index
    %c0_49 = arith.constant 0 : index
    %90 = vector.load %arg7[%c0_46, %c0_47, %c0_48, %c0_49] : memref<1x1x8x32xf32, #tpu.memory_space<vmem>>, vector<1x1x8x32xf32>
    %91 = vector.shape_cast %90 : vector<1x1x8x32xf32> to vector<8x32xf32>
    %92 = vector.shape_cast %89 : vector<8x32xf32> to vector<1x1x8x32xf32>
    tpu.vector_store %arg7[%c0_46, %c0_47, %c0_48, %c0_49], %92 {strides = array<i32>} : memref<1x1x8x32xf32, #tpu.memory_space<vmem>>, vector<1x1x8x32xf32>,
    return
  }
  func.func @transform_0(%arg0: i32, %arg1: i32, %arg2: i32) -> (i32, i32, i32, i32) {
    %c0_i32 = arith.constant 0 : i32
    %c0_i32_0 = arith.constant 0 : i32
    return %arg0, %arg1, %arg2, %c0_i32 : i32, i32, i32, i32
  }
  func.func @transform_1(%arg0: i32, %arg1: i32, %arg2: i32) -> (i32, i32, i32, i32) {
    %c0_i32 = arith.constant 0 : i32
    %c0_i32_0 = arith.constant 0 : i32
    return %arg0, %arg1, %arg2, %c0_i32 : i32, i32, i32, i32
  }
  func.func @transform_2(%arg0: i32, %arg1: i32, %arg2: i32) -> (i32, i32, i32, i32) {
    %c0_i32 = arith.constant 0 : i32
    %c0_i32_0 = arith.constant 0 : i32
    return %arg0, %arg1, %arg2, %c0_i32 : i32, i32, i32, i32
  }
  func.func @transform_3(%arg0: i32, %arg1: i32, %arg2: i32) -> (i32, i32, i32, i32) {
    %c0_i32 = arith.constant 0 : i32
    %c0_i32_0 = arith.constant 0 : i32
    return %arg0, %arg1, %arg2, %c0_i32 : i32, i32, i32, i32
  }
  func.func @transform_4(%arg0: i32, %arg1: i32, %arg2: i32) -> (i32, i32, i32, i32) {
    %c0_i32 = arith.constant 0 : i32
    %c0_i32_0 = arith.constant 0 : i32
    return %arg0, %arg1, %arg2, %c0_i32 : i32, i32, i32, i32
  }
  func.func @transform_5(%arg0: i32, %arg1: i32, %arg2: i32) -> (i32, i32, i32, i32) {
    %c0_i32 = arith.constant 0 : i32
    %c0_i32_0 = arith.constant 0 : i32
    %c0_i32_1 = arith.constant 0 : i32
    return %arg0, %arg1, %c0_i32, %c0_i32_0 : i32, i32, i32, i32
  }
}

module attributes {stable_mosaic.version = 11 : i64} {
  func.func @_gated_out_kernel(%arg0: i32, %arg1: memref<32x128xf32, #tpu.memory_space<vmem>>, %arg2: memref<32x128xf32, #tpu.memory_space<vmem>>, %arg3: memref<128x128xf32, #tpu.memory_space<vmem>>, %arg4: memref<32x128xf32, #tpu.memory_space<vmem>>) attributes {dimension_semantics = [#tpu.dimension_semantics<parallel>], iteration_bounds = array<i64: 1>, scalar_prefetch = 0 : i64, scratch_operands = 0 : i64, tpu.core_type = #tpu.core_type<tc>, window_params = [{transform_indices = @transform_0, window_bounds = array<i64: 32, 128>}, {transform_indices = @transform_1, window_bounds = array<i64: 32, 128>}, {pipeline_mode = #tpu.pipeline_mode<synchronous>, transform_indices = @transform_2, window_bounds = array<i64: 128, 128>}, {transform_indices = @transform_3, window_bounds = array<i64: 32, 128>}]} {
    %c0 = arith.constant 0 : index
    %c0_0 = arith.constant 0 : index
    %0 = vector.load %arg1[%c0, %c0_0] : memref<32x128xf32, #tpu.memory_space<vmem>>, vector<32x128xf32>
    %1 = arith.negf %0 : vector<32x128xf32>
    %2 = math.exp %1 : vector<32x128xf32>
    %cst = arith.constant 1.000000e+00 : f32
    %3 = vector.broadcast %cst : f32 to vector<32x128xf32>
    %4 = arith.addf %3, %2 : vector<32x128xf32>
    %5 = arith.divf %3, %4 : vector<32x128xf32>
    %6 = arith.mulf %0, %5 : vector<32x128xf32>
    %c0_1 = arith.constant 0 : index
    %c0_2 = arith.constant 0 : index
    %7 = vector.load %arg2[%c0_1, %c0_2] : memref<32x128xf32, #tpu.memory_space<vmem>>, vector<32x128xf32>
    %8 = arith.mulf %6, %7 : vector<32x128xf32>
    %c0_3 = arith.constant 0 : index
    %c0_4 = arith.constant 0 : index
    %9 = vector.load %arg3[%c0_3, %c0_4] : memref<128x128xf32, #tpu.memory_space<vmem>>, vector<128x128xf32>
    %cst_5 = arith.constant dense<0.000000e+00> : vector<32x128xf32>
    %10 = tpu.matmul %8, %9, %cst_5 {dimension_numbers = #tpu.dot_dimension_numbers<[1], [0], [0], [1], [0, 0, 1, 1], [], []>} : vector<32x128xf32>, vector<128x128xf32>, vector<32x128xf32> -> vector<32x128xf32>
    %c0_6 = arith.constant 0 : index
    %c0_7 = arith.constant 0 : index
    %11 = vector.load %arg4[%c0_6, %c0_7] : memref<32x128xf32, #tpu.memory_space<vmem>>, vector<32x128xf32>
    tpu.vector_store %arg4[%c0_6, %c0_7], %10 {strides = array<i32>} : memref<32x128xf32, #tpu.memory_space<vmem>>, vector<32x128xf32>,
    return
  }
  func.func @transform_0(%arg0: i32) -> (i32, i32) {
    %c0_i32 = arith.constant 0 : i32
    %c0_i32_0 = arith.constant 0 : i32
    return %arg0, %c0_i32 : i32, i32
  }
  func.func @transform_1(%arg0: i32) -> (i32, i32) {
    %c0_i32 = arith.constant 0 : i32
    %c0_i32_0 = arith.constant 0 : i32
    return %arg0, %c0_i32 : i32, i32
  }
  func.func @transform_2(%arg0: i32) -> (i32, i32) {
    %c0_i32 = arith.constant 0 : i32
    %c0_i32_0 = arith.constant 0 : i32
    %c0_i32_1 = arith.constant 0 : i32
    return %c0_i32, %c0_i32_0 : i32, i32
  }
  func.func @transform_3(%arg0: i32) -> (i32, i32) {
    %c0_i32 = arith.constant 0 : i32
    %c0_i32_0 = arith.constant 0 : i32
    return %arg0, %c0_i32 : i32, i32
  }
}

</mosaic_0001>

<bundles_post_ra>
// kernel: gla_forward.4
= control target key start
LH: loop header
LB: loop body
LE: loop exit
PB: predicated region body
PF: predicated region fallthrough
CT: control target
= control target key end

     0   :  { %11 = vsyncpa [#allocation4], 0  ;;  %s1496_s0 = inlined_call_operand.vmem [shape: f32[2,4,16,16], index: 0, kind: input, shape index: {}]   ;;  %s1497_s1 = inlined_call_operand.vmem [shape: f32[2,4,16,16], index: 1, kind: input, shape index: {}]   ;;  %s1498_s2 = inlined_call_operand.vmem [shape: f32[2,4,16,32], index: 2, kind: input, shape index: {}]   ;;  %s1499_s3 = inlined_call_operand.vmem [shape: f32[2,4,16,16], index: 3, kind: input, shape index: {}]   ;;  %s1500_s4 = inlined_call_operand.vmem [shape: f32[2,4,16,32], index: 4, kind: output, shape index: {0}]   ;;  %s1501_s5 = inlined_call_operand.hbm [shape: f32[2,4,16,32], index: 5, kind: output, shape index: {1}]  }
   0x1   :  { %13 = vsyncpa [#allocation4 + $0x1], 0  ;;  %s1278_s18 = smov 0   ;;  %s1280_s19 = smov 0  }
   0x2   :  { %s1282_s20 = smov 0   ;;  %s1284_s21 = smov 0  }
   0x3   :  { %s1286_s22 = smov 0   ;;  %s1288_s23 = smov 0  }
   0x4   :  { %s1290_s24 = smov 0   ;;  %s1292_s25 = smov 0  }
   0x5   :  { %s1294_s26 = smov 0   ;;  %s1296_s27 = smov 0  }
   0x6 LB: > { %1508 = sst [smem:[#allocation6_spill]] %s1228_s24  ;;  %s983_s28 = sadd.s32 4294967295, %s1240_s27   ;;  %s1240_s27 = sphi %s1296_s27, %s19_s27   ;;  %s1236_s26 = sphi %s1294_s26, %s1524_s26   ;;  %s1232_s25 = sphi %s1292_s25, %s1523_s25   ;;  %s1228_s24 = sphi %s1290_s24, %s1522_s24   ;;  %s1224_s23 = sphi %s1288_s23, %s1521_s23   ;;  %s1220_s22 = sphi %s1286_s22, %s1520_s22   ;;  %s1216_s21 = sphi %s1284_s21, %s1519_s21   ;;  %s1212_s20 = sphi %s1282_s20, %s1527_s20   ;;  %s1208_s19 = sphi %s1280_s19, %s1526_s19   ;;  %s1204_s18 = sphi %s1278_s18, %s1525_s18  }
   0x7   : > { %1509 = sst [smem:[#allocation7_spill]] %s1232_s25  ;;  %s984_s29 = sadd.s32 4294967294, %s1240_s27  }
   0x8   : > { %1510 = sst [smem:[#allocation8_spill]] %s1236_s26  ;;  %s31_s30 = sadd.s32 1, %s1228_s24 }
   0x9   : > { %p32_p0 = scmp.ge.s32.totalorder %s31_s30, 2  ;;  %s34_s6 = sadd.s32 1, %s1232_s25 }
   0xa   : > { %s38_s7 = sadd.s32 1, %s1236_s26  ;;  %p207_p1 = scmp.ne.s32.totalorder %s1212_s20, %s1208_s19 }
   0xb   : > { %s1529_s30 = smov (%p32_p0, %s31_s30), 0  ;;  %s1531_s6 = smov (!%p32_p0, %s34_s6), %s1232_s25 }
   0xc   : > { %1511 = sst [smem:[#allocation9_spill]] %s1529_s30  ;;  %p208_p2 = scmp.eq.s32.totalorder %s983_s28, 15 }
   0xd   : > { %p213_p3 = scmp.ne.s32.totalorder %s1208_s19, %s1204_s18  ;;  %p36_p4 = scmp.ge.s32.totalorder %s1531_s6, 4 }
   0xe   : > { %p214_p5 = scmp.eq.s32.totalorder %s984_s29, 15  ;;  %p1340_p6 = por %p208_p2, %p207_p1 }
   0xf   : > { %s1533_s6 = smov (%p36_p4, %s1531_s6), 0  ;;  %s1535_s7 = smov (!%p36_p4, %s38_s7), %s1236_s26 }
  0x10   : > { %1513 = sst [smem:[#allocation10_spill]] %s1533_s6  ;;  %p1347_p7 = por %p214_p5, %p213_p3 }
  0x11   : > { %p987_p8 = scmp.ge.s32.totalorder %s1240_s27, 1  ;;  %p40_p9 = scmp.ge.s32.totalorder %s1535_s7, 2 }
  0x12   : > { %p292_p10 = scmp.lt.s32.totalorder %s1240_s27, 17  ;;  %s193_s10 = ssub.s32 %s1232_s25, %s1533_s6 }
  0x13   : > { %s1537_s7 = smov (%p40_p9, %s1535_s7), 0  ;;  %s197_s13 = sadd.s32 1, %s1212_s20 }
  0x14   : > { %1515 = sst [smem:[#allocation11_spill]] %s1537_s7  ;;  %p293_p11 = pnand %p987_p8, %p292_p10 }
  0x15   : > { %s192_s11 = ssub.s32 %s1236_s26, %s1537_s7  ;;  %s1504_s15 = sand.u32 (!%p293_p11), 1, %s1208_s19  }
  0x16   : > { %s194_s12 = sor.u32 %s193_s10, %s192_s11  ;;  %p375_p13 = scmp.lt.s32.totalorder (!%p293_p11), %s1224_s23, 1 }
  0x17   : > { %p195_p12 = scmp.eq.s32.totalorder %s194_s12, 0  ;;  %296 = sbr.rel (%p293_p11) target bundleno = 751 (0x2ef), region = 36 }
  0x18   : > { %s988_s16 = sshll.u32 (!%p293_p11), %s1504_s15, 4  ;;  %p377_p0 = scmp.lt.s32.totalorder (!%p293_p11), %s1220_s22, 3 }
  0x19   : > { %s1361_s14 = scalar_select %p195_p12, %s1212_s20, %s197_s13  }
  0x1a   : > { %p379_p1 = scmp.lt.s32.totalorder (!%p293_p11), %s1216_s21, 1  ;;  %s1394_s6 = scalar_lea.vmem (!%p293_p11), [#allocation3], %s988_s16 }
  0x1b   : > { %1516 = sst [smem:[#allocation12_spill]] %s1361_s14  ;;  %p1004_p2 = scmp.ne.s32.totalorder (!%p293_p11), %s1216_s21, 0 }
  0x1c   : > { %s376_s17 = scalar_select %p375_p13, %s1224_s23, 1 }
  0x1d   : > { %s378_s28 = scalar_select %p377_p0, %s1220_s22, 3 }
  0x1e   : > { %s380_s29 = scalar_select %p379_p1, %s1216_s21, 1 }
  0x1f   : > { %s989_s10 = sshll.u32 %s378_s28, 1  ;;  %s990_s11 = sshll.u32 %s376_s17, 3 }
  0x20   : > { %s382_s12 = sadd.s32 %s989_s10, %s380_s29 }
  0x21   : > { %s384_s13 = sadd.s32 %s990_s11, %s382_s12  ;;  %438 = sbr.rel (%p1004_p2) target bundleno = 41 (0x29), region = 40 }
  0x22   : > { %s1372_s7 = sshll.u32 %s384_s13, 3 }
  0x23   : > { %s386_s15 = scalar_lea.vmem %s1496_s0, %s1372_s7  ;;  %s398_s24 = scalar_lea.vmem %s1497_s1, %s1372_s7 }
  0x24   : > { %s410_s17 = scalar_lea.vmem %s1498_s2, %s1372_s7  ;;  %s422_s11 = scalar_lea.vmem %s1499_s3, %s1372_s7 }
  0x25   : > { %s434_s30 = scalar_lea.vmem %s1500_s4, %s1372_s7 }
  0x26   : > { %vm439_vm0 = vcmask 261120   ;;  %v1242_v0 = vmov 0.0  }
  0x27   : > { %440 = vst.msk [vmem:[#allocation2] sm:$0xff] %vm439_vm0, %v1242_v0 }
  0x28   : > { %441 = vst.msk [vmem:[#allocation2 + $0x8] sm:$0xff] %vm439_vm0, %v1242_v0 }
  0x29 PF: > { %v442_v1 = vld [vmem:[%s422_s11] sm:$0xff]  ;;  %v464_v11 = vlaneseq  ;;  %v1243_v23 = vmov 0.0   ;;  %vm471_vm4 = vcmask 64512   ;;  %vm495_vm5 = vcmask 130048   ;;  %s766_s13 = sshll.u32 %s1394_s6, 4  ;;  %s1150_s28 = scalar_lea.hbm %s1501_s5, 128  ;;  %s767_s13 = int_to_ptr.vmem [resolvable:$true] %s766_s13 }
  0x2a   : > { %v443_v2 = vsub.f32 0.0, %v442_v1  ;;  %v506_v31 = vld [vmem:[%s410_s17] sm:$0xff]  ;;  %vm699_vm6 = vcmask 261120   ;;  %v1244_v60 = vmov 32.0   ;;  %v1245_v62 = vmov 0  }
  0x2b   : > { %v465_v16 = vshrl.u32 %v464_v11, 7  ;;  %v467_v17 = vand.u32 127, %v464_v11  ;;  %689 = vmatpush.msra.mxu0 %v506_v31  ;;  %v504_v41 = vld [vmem:[%s398_s24] sm:$0xff]  ;;  %1112 = vset.pattern.permute.xlu2 %v1245_v62  ;;  %s1014_s24 = sshll.u32 %s1220_s22, 1  ;;  %s1517_s22 = sand.u32 1, %s1208_s19  }
  0x2c   : > { %v447_v3 = vand.u32 2147483647, %v443_v2  ;;  %v444_v14 = vmax.f32 %v443_v2, 0.0  ;;  %vm445_vm2 = vcmp.ne.f32.partialorder %v443_v2, %v443_v2  ;;  %v503_v42 = vld [vmem:[%s386_s15] sm:$0xff]  ;;  %v505_v43 = vmul.f32 0.17677669, %v504_v41 }
  0x2d   : > { %vm468_vm3 = vcmp.ge.s32.totalorder %v465_v16, %v467_v17  ;;  %s1015_s15 = sshll.u32 %s1224_s23, 3  ;;  %s749_s23 = scalar_lea.sflag [#allocation4], %s1517_s22 }
  0x2e   : > { %v448_v4 = vsub.f32 0.0, %v447_v3  ;;  %v1005_v24 = vsel %vm468_vm3, 1.0, %v1243_v23  ;;  %v1402_v27 = vld [vmem:[#allocation2] sm:$0xff]  ;;  %s763_s17 = sadd.s32 %s1015_s15, %s1014_s24 }
  0x2f   : > { %v1400_v26 = vld [vmem:[#allocation2 + $0x8] sm:$0xff]  ;;  %s1016_s29 = sshll.u32 %s763_s17, 3 }
  0x30   : > { %v449_v5 = vmul.f32 1.442695, %v448_v4  ;;  %584 = vmatpush.msra.mxu3 %v1400_v26  ;;  %s765_s12 = scalar_lea.hbm %s1501_s5, %s1016_s29 }
  0x31   : > { %s768_s21 = sshll.u32 %s765_s12, 4  ;;  %s769_s21 = int_to_ptr.hbm [resolvable:$true] %s768_s21 }
  0x32   : > { %1114 = vpow2.f32 %v449_v5  ;;  %585 = vmatpush.msra.mxu3 %v1402_v27  ;;  %s1144_s25 = sshra.s32 %s769_s21, 4  ;;  %s1145_s25 = int_to_ptr.hbm [resolvable:$true] %s1144_s25 }
  0x33   : > { %s1146_s26 = scalar_lea.hbm %s1145_s25, 16  ;;  %p1151_p8 = scmp.lt.s32.totalorder %s1145_s25, %s1501_s5 }
  0x34   : > { %p1147_p3 = scmp.ne.s32.totalorder %s1145_s25, %s1146_s26  ;;  %p1152_p9 = scmp.lt.s32.totalorder %s1150_s28, %s1146_s26 }
  0x36   : > { %p1148_p4 = pnand %p1147_p3, %p1340_p6  ;;  %p1153_p10 = por %p1152_p9, %p1151_p8 }
  0x38   : > { %v1115_v6 = vpop.eup %1114  ;;  %p1149_p5 = pneg %p1148_p4 }
  0x39   : > { %v451_v7 = vadd.f32 1.0, %v1115_v6  ;;  %v454_v8 = vmul.f32 -0.5, %v1115_v6  ;;  %v457_v10 = vand.u32 2147483647, %v1115_v6 }
  0x3a   : > { %p1154_p11 = pnand %p1153_p10, %p1149_p5 }
  0x3b   : > { %1116 = vlog2.f32 %v451_v7  ;;  %v455_v9 = vadd.f32 1.0, %v454_v8  ;;  %vm458_vm1 = vcmp.lt.f32.partialorder %v457_v10, 0.0004427343 }
  0x3d   : > { %v456_v12 = vmul.f32 %v1115_v6, %v455_v9 }
  0x41   : > { %v1117_v13 = vpop.eup %1116 }
  0x42   : > { %v453_v15 = vmul.f32 0.6931472, %v1117_v13 }
  0x44   : > { %v459_v18 = vsel %vm458_vm1, %v456_v12, %v453_v15 }
  0x45   : > { %v460_v19 = vadd.f32 %v459_v18, %v444_v14 }
  0x47   : > { %v461_v20 = vsel %vm445_vm2, %v443_v2, %v460_v19 }
  0x48   : > { %v462_v21 = vsub.f32 0.0, %v461_v20 }
  0x4a   : > { %v463_v22 = vmul.f32 0.0625, %v462_v21 }
  0x4c   : > { %490 = vmatpush.msra.mxu2 %v463_v22  ;;  %v496_v25 = vsel %vm495_vm5, %v463_v22, 0.0 }
  0x4d   : > { %1006 = vmatmul.msk.f32.vlgmr.msra.gmra.mxu2 %vm471_vm4, %v1005_v24  ;;  %v497_v28 = vrot.slane %v496_v25, 4 }
  0x4e   : > { %565 = vmatpush.msrb.mxu2 %v506_v31 }
  0x4f   : > { %v498_v29 = vadd.f32 %v497_v28, %v496_v25 }
  0x51   : > { %v499_v30 = vrot.slane %v498_v29, 2 }
  0x53   : > { %v500_v32 = vadd.f32 %v499_v30, %v498_v29 }
  0x55   : > { %v501_v33 = vrot.slane %v500_v32, 1 }
  0x57   : > { %v502_v34 = vadd.f32 %v501_v33, %v500_v32 }
  0x59   : > { %v590_v50 = vmul.f32 1.442695, %v502_v34 }
  0xd0   : > { %v492_v35 = vpop.f32.mrf.mxu2 }
  0xd1   : > { %v507_v36 = vmul.f32 1.442695, %v492_v35  ;;  %v510_v37 = vsub.f32 0.0, %v492_v35  ;;  %v514_v38 = vsub.f32 %v502_v34, %v492_v35 }
  0xd3   : > { %1118 = vpow2.f32 %v507_v36  ;;  %v511_v39 = vmul.f32 1.442695, %v510_v37  ;;  %v515_v40 = vmul.f32 1.442695, %v514_v38 }
  0xd5   : > { %1120 = vpow2.f32 %v511_v39 }
  0xd6   : > { %1122 = vpow2.f32 %v515_v40 }
  0xd7   : > { %1124 = vpow2.f32 %v590_v50 }
  0xd8   : > { %1126 = vrcp.f32 %v1244_v60 }
  0xd9   : > { %v1119_v44 = vpop.eup %1118 }
  0xda   : > { %v509_v45 = vmul.f32 %v1119_v44, %v503_v42 }
  0xdb   : > { %v1121_v46 = vpop.eup %1120 }
  0xdc   : > { %v1123_v47 = vpop.eup %1122  ;;  %1010 = vmatmul.msk.f32.vlgmr.msra.gmra.mxu3 %vm495_vm5, %v509_v45  ;;  %v513_v48 = vmul.f32 %v1121_v46, %v505_v43 }
  0xdd   : > { %v517_v49 = vmul.f32 %v1123_v47, %v505_v43  ;;  %v1125_v51 = vpop.eup %1124 }
  0xde   : > { %1007 = vmatpush.xpose.msk.msra.mxu1 %vm495_vm5, %v513_v48  ;;  %592 = vxpose.xlu1.b32.start.end [1/1] (short) (narrow) %v1125_v51, 16  ;;  %v1127_v63 = vpop.eup %1126 }
  0xdf   : > { %636 = vxpose.xlu0.b32.start.end [1/1] (short) (narrow) %v517_v49, 16  ;;  %v710_v0 = vmul.f32 32.0, %v1127_v63  ;;  %vm714_vm7 = vweird.f32 %v1127_v63 }
  0xe1   : > { %1008 = vmatmul.msk.f32.vlgmr.msra.gmra.mxu1 %vm495_vm5, %v509_v45  ;;  %v711_v2 = vsub.f32 1.0, %v710_v0 }
  0xe3   : > { %v712_v3 = vmul.f32 %v1127_v63, %v711_v2 }
  0xe5   : > { %v713_v4 = vadd.f32 %v1127_v63, %v712_v3 }
  0xe7   : > { %v715_v5 = vsel %vm714_vm7, %v1127_v63, %v713_v4 }
 0x146   : > { %1113 = vset.pattern.permute.xlu0 %v1245_v62 }
 0x15e   : > { %v543_v52 = vpop.f32.mrf.mxu1 }
 0x15f   : > { %v546_v53 = vsel %vm468_vm3, %v543_v52, 0.0  ;;  %v587_v56 = vpop.f32.mrf.mxu3 }
 0x160   : > { %1009 = vmatmul.msk.f32.vlgmr.msrb.gmra.mxu2 %vm471_vm4, %v546_v53 }
 0x182   : > { %v608_v61 = vpop.trf.xlu1 }
 0x183   : > { %v652_v54 = vpop.trf.xlu0  ;;  %626 = vperm.xlu2 %1112, %v608_v61  }
 0x184   : > { %1011 = vmatmul.msk.f32.vlgmr.msra.gmra.mxu0 %vm471_vm4, %v652_v54 }
 0x18a   : > { %v609_v1 = vpop.trf.xlu1 }
 0x18b   : > { %v653_v55 = vpop.trf.xlu0  ;;  %631 = vperm.xlu2 %1112, %v609_v1  }
 0x18c   : > { %1012 = vmatmul.msk.f32.gmra.mxu0 %vm471_vm4, %v653_v55 }
 0x1dd   : > { %v627_v12 = vpop.permute.xlu2 %626 }
 0x1de   : > { %v634_v13 = vmul.f32 %v627_v12, %v1402_v27 }
 0x1e3   : > { %v567_v57 = vpop.f32.mrf.mxu2 }
 0x1e4   : > { %v588_v58 = vadd.f32 %v587_v56, %v567_v57 }
 0x1e5   : > { %v632_v15 = vpop.permute.xlu2 %631 }
 0x1e6   : > { %v706_v59 = vsel %vm699_vm6, %v588_v58, 0.0  ;;  %v635_v17 = vmul.f32 %v632_v15, %v1400_v26 }
 0x1e7   : > { %707 = vadd.xlane.f32.xlu0 %v706_v59 }
 0x201   : > { %v691_v11 = vpop.f32.mrf.mxu0 }
 0x202   : > { %v697_v14 = vadd.f32 %v691_v11, %v634_v13 }
 0x204   : > { %700 = vst.msk [vmem:[#allocation2] sm:$0xff] %vm699_vm6, %v697_v14 }
 0x209   : > { %v694_v16 = vpop.f32.mrf.mxu0 }
 0x20a   : > { %v698_v18 = vadd.f32 %v694_v16, %v635_v17 }
 0x20b   : > { %v702_v19 = vld [vmem:[#allocation2] sm:$0xff] }
 0x20c   : > { %701 = vst.msk [vmem:[#allocation2 + $0x8] sm:$0xff] %vm699_vm6, %v698_v18 }
 0x20d   : > { %704 = vst.msk [vmem:[%s1394_s6] sm:$0xff] %vm699_vm6, %v702_v19 }
 0x213   : > { %v703_v20 = vld [vmem:[#allocation2 + $0x8] sm:$0xff] }
 0x214   : > { %705 = vst.msk [vmem:[%s1394_s6 + $0x8] sm:$0xff] %vm699_vm6, %v703_v20 }
 0x25a   : > { %v708_v6 = vpop.xlane.xlu0 %707 }
 0x25b   : > { %v716_v7 = vmul.f32 %v715_v5, %v708_v6 }
 0x25d   : > { %v717_v8 = vsub.f32 %v588_v58, %v716_v7 }
 0x25f   : > { %v718_v9 = vmul.f32 %v717_v8, %v717_v8 }
 0x261   : > { %v719_v10 = vsel %vm699_vm6, %v718_v9, 0.0 }
 0x262   : > { %720 = vadd.xlane.f32.xlu1 %v719_v10 }
 0x263   : > { %1157 = shalt.err (!%p1154_p11)
}
 0x264   : > { %s1246_s6 = smov 128   ;;  %s1247_s17 = smov 8  }
 0x265   : > { %1019 = dma.vmem_to_hbm [thread:$0]  (%p1340_p6), %s767_s13, 256, %s769_s21, %s749_s23, %s1246_s6, %s1246_s6, %s1247_s17  }
 0x2d5   : > { %v721_v21 = vpop.xlane.xlu1 %720 }
 0x2d6   : > { %v722_v22 = vmul.f32 %v721_v21, %v715_v5 }
 0x2d8   : > { %v723_v23 = vadd.f32 1e-05, %v722_v22 }
 0x2da   : > { %1128 = vrsqrt.f32 %v723_v23  ;;  %vm730_vm9 = vweird.f32 %v723_v23 }
 0x2e0   : > { %v1129_v24 = vpop.eup %1128 }
 0x2e1   : > { %v725_v25 = vmul.f32 %v1129_v24, %v723_v23  ;;  %vm731_vm8 = vweird.f32 %v1129_v24 }
 0x2e2   : > { %vm732_vm10 = vmor %vm730_vm9, %vm731_vm8 }
 0x2e3   : > { %v726_v26 = vmul.f32 %v1129_v24, %v725_v25 }
 0x2e5   : > { %v727_v27 = vmul.f32 0.5, %v726_v26 }
 0x2e7   : > { %v728_v28 = vsub.f32 1.5, %v727_v27 }
 0x2e9   : > { %v729_v29 = vmul.f32 %v1129_v24, %v728_v28 }
 0x2eb   : > { %v733_v30 = vsel %vm732_vm10, %v1129_v24, %v729_v29 }
 0x2ec   : > { %v734_v31 = vmul.f32 %v733_v30, %v717_v8 }
 0x2ee   : > { %735 = vst.msk [vmem:[%s434_s30] sm:$0xff] %vm699_vm6, %v734_v31 }
 0x2ef PF: > { %p1025_p6 = scmp.ge.s32.totalorder %s1240_s27, 2  ;;  %s798_s10 = sand.u32 1, %s1204_s18  }
 0x2f0   : > { %s799_s11 = scalar_lea.sflag [#allocation4], %s798_s10 }
 0x2f1   : > { %p1022_p12 = pnand %p1025_p6, %p1347_p7 }
 0x2f3   : > { %p1023_p13 = pneg %p1022_p12 }
 0x2f5   : > { %1199 = dma.done.wait (%p1023_p13), %s799_s11, 256  }
 0x2f6   : > { %1201 = vsyncadd (%p1023_p13), %s799_s11, 4294967040  ;;  %s19_s27 = sadd.s32 1, %s1240_s27   ;;  %s1518_s12 = sld [smem:[#allocation12_spill]] }
 0x2f7   : > { %p16_p0 = scmp.ge.s32.totalorder %s19_s27, 18   ;;  %s1519_s21 = sld [smem:[#allocation6_spill]] }
 0x2f8   : > { %s1520_s22 = sld [smem:[#allocation7_spill]]  ;;  %s1525_s18 = smov %s1208_s19 }
 0x2f9   : > { %s1521_s23 = sld [smem:[#allocation8_spill]]  ;;  %s1526_s19 = smov %s1212_s20 }
 0x2fa   : > { %s1522_s24 = sld [smem:[#allocation9_spill]]  ;;  %18 = sbr.rel (!%p16_p0) target bundleno = 6 (0x6), region = 96 }
 0x2fb   : > { %s1523_s25 = sld [smem:[#allocation10_spill]] }
 0x2fc   : > { %s1524_s26 = sld [smem:[#allocation11_spill]]  ;;  %s1527_s20 = smov %s1518_s12 }
 0x2ff   :  { %805 = vsyncpa [#allocation4], 1 }
 0x300   :  { %807 = vsyncpa [#allocation4 + $0x1], 1 }

// kernel: gla_forward.3
= control target key start
LH: loop header
LB: loop body
LE: loop exit
PB: predicated region body
PF: predicated region fallthrough
CT: control target
= control target key end

     0   :  { %vm86_vm0 = vcmask 523264   ;;  %vm293_vm1 = vcmask 130048   ;;  %s817_s3 = inlined_call_operand.vmem [shape: f32[128,128], index: 3, kind: input, shape index: {}]   ;;  %s818_s1 = inlined_call_operand.vmem [shape: f32[128,64], index: 1, kind: input, shape index: {}]   ;;  %s819_s0 = inlined_call_operand.vmem [shape: f32[32,128], index: 0, kind: input, shape index: {}]   ;;  %s820_s5 = inlined_call_operand.vmem [shape: f32[128,16], index: 5, kind: input, shape index: {}]   ;;  %s821_s4 = inlined_call_operand.vmem [shape: f32[128,128], index: 4, kind: input, shape index: {}]   ;;  %s822_s2 = inlined_call_operand.vmem [shape: f32[128,64], index: 2, kind: input, shape index: {}]   ;;  %s823_s6 = inlined_call_operand.vmem [shape: f32[16,64], index: 6, kind: input, shape index: {}]   ;;  %s824_s7 = inlined_call_operand.vmem [shape: f32[1,128], index: 7, kind: input, shape index: {}]   ;;  %s825_s9 = inlined_call_operand.vmem [shape: f32[32,64], index: 9, kind: output, shape index: {0}]   ;;  %s826_s11 = inlined_call_operand.vmem [shape: f32[32,128], index: 11, kind: output, shape index: {2}]   ;;  %s827_s8 = inlined_call_operand.vmem [shape: f32[1,64], index: 8, kind: input, shape index: {}]   ;;  %s828_s10 = inlined_call_operand.vmem [shape: f32[32,64], index: 10, kind: output, shape index: {1}]   ;;  %s829_s12 = inlined_call_operand.vmem [shape: f32[32,128], index: 12, kind: output, shape index: {3}]   ;;  %s830_s13 = inlined_call_operand.vmem [shape: f32[32,64], index: 13, kind: output, shape index: {4}]  }
   0x1   :  { %v155_v0 = vld [vmem:[%s817_s3 + $0x78] sm:$0xff]  ;;  %v154_v1 = vld [vmem:[%s817_s3 + $0x70] sm:$0xff]  ;;  %v153_v2 = vld [vmem:[%s817_s3 + $0x68] sm:$0xff] }
   0x2   :  { %156 = vmatpush.msra.mxu2 %v155_v0  ;;  %v56_v3 = vld [vmem:[%s818_s1 + $0x78] sm:$0xff]  ;;  %v55_v4 = vld [vmem:[%s818_s1 + $0x70] sm:$0xff]  ;;  %v152_v5 = vld [vmem:[%s817_s3 + $0x60] sm:$0xff] }
   0x3   :  { %57 = vmatpush.msra.mxu0 %v56_v3  ;;  %v54_v6 = vld [vmem:[%s818_s1 + $0x68] sm:$0xff]  ;;  %v151_v7 = vld [vmem:[%s817_s3 + $0x58] sm:$0xff]  ;;  %v53_v8 = vld [vmem:[%s818_s1 + $0x60] sm:$0xff] }
   0x4   :  { %157 = vmatpush.msra.mxu2 %v154_v1  ;;  %v150_v9 = vld [vmem:[%s817_s3 + $0x50] sm:$0xff]  ;;  %v52_v10 = vld [vmem:[%s818_s1 + $0x58] sm:$0xff]  ;;  %v149_v11 = vld [vmem:[%s817_s3 + $0x48] sm:$0xff] }
   0x5   :  { %58 = vmatpush.msra.mxu0 %v55_v4  ;;  %v51_v12 = vld [vmem:[%s818_s1 + $0x50] sm:$0xff]  ;;  %v148_v13 = vld [vmem:[%s817_s3 + $0x40] sm:$0xff]  ;;  %v50_v14 = vld [vmem:[%s818_s1 + $0x48] sm:$0xff] }
   0x6   :  { %158 = vmatpush.msra.mxu2 %v153_v2  ;;  %v147_v15 = vld [vmem:[%s817_s3 + $0x38] sm:$0xff]  ;;  %v49_v16 = vld [vmem:[%s818_s1 + $0x40] sm:$0xff]  ;;  %v146_v17 = vld [vmem:[%s817_s3 + $0x30] sm:$0xff] }
   0x7   :  { %59 = vmatpush.msra.mxu0 %v54_v6  ;;  %v48_v18 = vld [vmem:[%s818_s1 + $0x38] sm:$0xff]  ;;  %v145_v19 = vld [vmem:[%s817_s3 + $0x28] sm:$0xff]  ;;  %v47_v20 = vld [vmem:[%s818_s1 + $0x30] sm:$0xff] }
   0x8   :  { %159 = vmatpush.msra.mxu2 %v152_v5  ;;  %v144_v21 = vld [vmem:[%s817_s3 + $0x20] sm:$0xff]  ;;  %v46_v22 = vld [vmem:[%s818_s1 + $0x28] sm:$0xff]  ;;  %v143_v23 = vld [vmem:[%s817_s3 + $0x18] sm:$0xff] }
   0x9   :  { %60 = vmatpush.msra.mxu0 %v53_v8  ;;  %v45_v24 = vld [vmem:[%s818_s1 + $0x20] sm:$0xff]  ;;  %v142_v25 = vld [vmem:[%s817_s3 + $0x10] sm:$0xff]  ;;  %v44_v26 = vld [vmem:[%s818_s1 + $0x18] sm:$0xff] }
   0xa   :  { %160 = vmatpush.msra.mxu2 %v151_v7  ;;  %v141_v27 = vld [vmem:[%s817_s3 + $0x8] sm:$0xff]  ;;  %v43_v28 = vld [vmem:[%s818_s1 + $0x10] sm:$0xff]  ;;  %v140_v29 = vld [vmem:[%s817_s3] sm:$0xff] }
   0xb   :  { %61 = vmatpush.msra.mxu0 %v52_v10  ;;  %v42_v30 = vld [vmem:[%s818_s1 + $0x8] sm:$0xff]  ;;  %v549_v31 = vld [vmem:[%s819_s0] sm:$0xff]  ;;  %v257_v32 = vld [vmem:[%s820_s5 + $0x78] sm:$0xff] }
   0xc   :  { %161 = vmatpush.msra.mxu2 %v150_v9  ;;  %v41_v33 = vld [vmem:[%s818_s1] sm:$0xff]  ;;  %v256_v34 = vld [vmem:[%s820_s5 + $0x70] sm:$0xff]  ;;  %v255_v35 = vld [vmem:[%s820_s5 + $0x68] sm:$0xff] }
   0xd   :  { %62 = vmatpush.msra.mxu0 %v51_v12  ;;  %v254_v36 = vld [vmem:[%s820_s5 + $0x60] sm:$0xff]  ;;  %v571_v37 = vld [vmem:[%s819_s0 + $0x8] sm:$0xff]  ;;  %v253_v38 = vld [vmem:[%s820_s5 + $0x58] sm:$0xff] }
   0xe   :  { %162 = vmatpush.msra.mxu2 %v149_v11  ;;  %v252_v39 = vld [vmem:[%s820_s5 + $0x50] sm:$0xff]  ;;  %v251_v40 = vld [vmem:[%s820_s5 + $0x48] sm:$0xff]  ;;  %v204_v41 = vld [vmem:[%s821_s4 + $0x78] sm:$0xff] }
   0xf   :  { %63 = vmatpush.msra.mxu0 %v50_v14  ;;  %v203_v42 = vld [vmem:[%s821_s4 + $0x70] sm:$0xff]  ;;  %v106_v43 = vld [vmem:[%s822_s2 + $0x78] sm:$0xff]  ;;  %v250_v45 = vld [vmem:[%s820_s5 + $0x40] sm:$0xff]  ;;  %209 = vmatpush.msra.mxu3 %v204_v41 }
  0x10   :  { %163 = vmatpush.msra.mxu2 %v148_v13  ;;  %v105_v44 = vld [vmem:[%s822_s2 + $0x70] sm:$0xff]  ;;  %107 = vmatpush.msra.mxu1 %v106_v43  ;;  %v202_v47 = vld [vmem:[%s821_s4 + $0x68] sm:$0xff]  ;;  %v249_v48 = vld [vmem:[%s820_s5 + $0x38] sm:$0xff] }
  0x11   :  { %64 = vmatpush.msra.mxu0 %v49_v16  ;;  %v602_v46 = vld [vmem:[%s819_s0 + $0x10] sm:$0xff]  ;;  %210 = vmatpush.msra.mxu3 %v203_v42  ;;  %v201_v49 = vld [vmem:[%s821_s4 + $0x60] sm:$0xff]  ;;  %v200_v51 = vld [vmem:[%s821_s4 + $0x58] sm:$0xff] }
  0x12   :  { %164 = vmatpush.msra.mxu2 %v147_v15  ;;  %108 = vmatpush.msra.mxu1 %v105_v44  ;;  %v248_v50 = vld [vmem:[%s820_s5 + $0x30] sm:$0xff]  ;;  %v104_v52 = vld [vmem:[%s822_s2 + $0x68] sm:$0xff]  ;;  %v103_v55 = vld [vmem:[%s822_s2 + $0x60] sm:$0xff] }
  0x13   :  { %65 = vmatpush.msra.mxu0 %v48_v18  ;;  %211 = vmatpush.msra.mxu3 %v202_v47  ;;  %v247_v53 = vld [vmem:[%s820_s5 + $0x28] sm:$0xff]  ;;  %v199_v54 = vld [vmem:[%s821_s4 + $0x50] sm:$0xff]  ;;  %v246_v56 = vld [vmem:[%s820_s5 + $0x20] sm:$0xff] }
  0x14   :  { %165 = vmatpush.msra.mxu2 %v146_v17  ;;  %109 = vmatpush.msra.mxu1 %v104_v52  ;;  %v639_v57 = vld [vmem:[%s819_s0 + $0x18] sm:$0xff]  ;;  %v198_v58 = vld [vmem:[%s821_s4 + $0x48] sm:$0xff]  ;;  %v244_v61 = vld [vmem:[%s820_s5 + $0x10] sm:$0xff] }
  0x15   :  { %66 = vmatpush.msra.mxu0 %v47_v20  ;;  %212 = vmatpush.msra.mxu3 %v201_v49  ;;  %v245_v59 = vld [vmem:[%s820_s5 + $0x18] sm:$0xff]  ;;  %v197_v62 = vld [vmem:[%s821_s4 + $0x40] sm:$0xff]  ;;  %v101_v63 = vld [vmem:[%s822_s2 + $0x50] sm:$0xff] }
  0x16   :  { %166 = vmatpush.msra.mxu2 %v145_v19  ;;  %110 = vmatpush.msra.mxu1 %v103_v55  ;;  %v102_v60 = vld [vmem:[%s822_s2 + $0x58] sm:$0xff]  ;;  %v243_v0 = vld [vmem:[%s820_s5 + $0x8] sm:$0xff]  ;;  %v242_v3 = vld [vmem:[%s820_s5] sm:$0xff] }
  0x17   :  { %67 = vmatpush.msra.mxu0 %v46_v22  ;;  %213 = vmatpush.msra.mxu3 %v200_v51  ;;  %v196_v1 = vld [vmem:[%s821_s4 + $0x38] sm:$0xff]  ;;  %v100_v2 = vld [vmem:[%s822_s2 + $0x48] sm:$0xff]  ;;  %v195_v4 = vld [vmem:[%s821_s4 + $0x30] sm:$0xff] }
  0x18   :  { %167 = vmatpush.msra.mxu2 %v144_v21  ;;  %111 = vmatpush.msra.mxu1 %v102_v60  ;;  %v99_v5 = vld [vmem:[%s822_s2 + $0x40] sm:$0xff]  ;;  %v194_v6 = vld [vmem:[%s821_s4 + $0x28] sm:$0xff]  ;;  %v98_v7 = vld [vmem:[%s822_s2 + $0x38] sm:$0xff] }
  0x19   :  { %68 = vmatpush.msra.mxu0 %v45_v24  ;;  %214 = vmatpush.msra.mxu3 %v199_v54  ;;  %v193_v8 = vld [vmem:[%s821_s4 + $0x20] sm:$0xff]  ;;  %v97_v9 = vld [vmem:[%s822_s2 + $0x30] sm:$0xff]  ;;  %v192_v10 = vld [vmem:[%s821_s4 + $0x18] sm:$0xff] }
  0x1a   :  { %168 = vmatpush.msra.mxu2 %v143_v23  ;;  %112 = vmatpush.msra.mxu1 %v101_v63  ;;  %v96_v11 = vld [vmem:[%s822_s2 + $0x28] sm:$0xff]  ;;  %v191_v12 = vld [vmem:[%s821_s4 + $0x10] sm:$0xff]  ;;  %v95_v13 = vld [vmem:[%s822_s2 + $0x20] sm:$0xff] }
  0x1b   :  { %69 = vmatpush.msra.mxu0 %v44_v26  ;;  %215 = vmatpush.msra.mxu3 %v198_v58  ;;  %v190_v14 = vld [vmem:[%s821_s4 + $0x8] sm:$0xff]  ;;  %v94_v15 = vld [vmem:[%s822_s2 + $0x18] sm:$0xff]  ;;  %v189_v16 = vld [vmem:[%s821_s4] sm:$0xff] }
  0x1c   :  { %169 = vmatpush.msra.mxu2 %v142_v25  ;;  %113 = vmatpush.msra.mxu1 %v100_v2  ;;  %v288_v17 = vld [vmem:[%s823_s6 + $0x8] sm:$0xff]  ;;  %v93_v18 = vld [vmem:[%s822_s2 + $0x10] sm:$0xff]  ;;  %v91_v20 = vld [vmem:[%s822_s2] sm:$0xff] }
  0x1d   :  { %70 = vmatpush.msra.mxu0 %v43_v28  ;;  %216 = vmatpush.msra.mxu3 %v197_v62  ;;  %v92_v19 = vld [vmem:[%s822_s2 + $0x8] sm:$0xff]  ;;  %v287_v21 = vld [vmem:[%s823_s6] sm:$0xff] }
  0x1e   :  { %170 = vmatpush.msra.mxu2 %v141_v27  ;;  %114 = vmatpush.msra.mxu1 %v99_v5  ;;  %v382_v47 = vld [vmem:[%s827_s8] ss:$0 sm:$0xff] }
  0x1f   :  { %71 = vmatpush.msra.mxu0 %v42_v30  ;;  %217 = vmatpush.msra.mxu3 %v196_v1 }
  0x20   :  { %171 = vmatpush.msra.mxu2 %v140_v29  ;;  %115 = vmatpush.msra.mxu1 %v98_v7 }
  0x21   :  { %172 = vmatmul.f32.vlgmr.msra.gmra.mxu2 %v549_v31  ;;  %72 = vmatpush.msra.mxu0 %v41_v33 }
  0x22   :  { %363 = vmatpush.msrb.mxu2 %v257_v32  ;;  %73 = vmatmul.f32.vlgmr.msra.gmra.mxu0 %v549_v31 }
  0x23   :  { %258 = vmatpush.msrb.mxu0 %v257_v32  ;;  %218 = vmatpush.msra.mxu3 %v195_v4 }
  0x24   :  { %364 = vmatpush.msrb.mxu2 %v256_v34  ;;  %116 = vmatpush.msra.mxu1 %v97_v9 }
  0x25   :  { %259 = vmatpush.msrb.mxu0 %v256_v34  ;;  %219 = vmatpush.msra.mxu3 %v194_v6  ;;  %v381_v34 = vld [vmem:[%s824_s7] ss:$0 sm:$0xff] }
  0x26   :  { %365 = vmatpush.msrb.mxu2 %v255_v35  ;;  %117 = vmatpush.msra.mxu1 %v96_v11 }
  0x27   :  { %260 = vmatpush.msrb.mxu0 %v255_v35  ;;  %220 = vmatpush.msra.mxu3 %v193_v8 }
  0x28   :  { %366 = vmatpush.msrb.mxu2 %v254_v36  ;;  %118 = vmatpush.msra.mxu1 %v95_v13 }
  0x29   :  { %175 = vmatmul.f32.gmra.mxu2 %v571_v37  ;;  %261 = vmatpush.msrb.mxu0 %v254_v36 }
  0x2a   :  { %367 = vmatpush.msrb.mxu2 %v253_v38  ;;  %76 = vmatmul.f32.gmra.mxu0 %v571_v37 }
  0x2b   :  { %262 = vmatpush.msrb.mxu0 %v253_v38  ;;  %221 = vmatpush.msra.mxu3 %v192_v10 }
  0x2c   :  { %368 = vmatpush.msrb.mxu2 %v252_v39  ;;  %119 = vmatpush.msra.mxu1 %v94_v15 }
  0x2d   :  { %263 = vmatpush.msrb.mxu0 %v252_v39  ;;  %222 = vmatpush.msra.mxu3 %v191_v12 }
  0x2e   :  { %369 = vmatpush.msrb.mxu2 %v251_v40  ;;  %120 = vmatpush.msra.mxu1 %v93_v18 }
  0x2f   :  { %264 = vmatpush.msrb.mxu0 %v251_v40  ;;  %223 = vmatpush.msra.mxu3 %v190_v14 }
  0x30   :  { %370 = vmatpush.msrb.mxu2 %v250_v45  ;;  %121 = vmatpush.msra.mxu1 %v92_v19 }
  0x31   :  { %178 = vmatmul.f32.gmra.mxu2 %v602_v46  ;;  %265 = vmatpush.msrb.mxu0 %v250_v45 }
  0x32   :  { %371 = vmatpush.msrb.mxu2 %v249_v48  ;;  %79 = vmatmul.f32.gmra.mxu0 %v602_v46 }
  0x33   :  { %266 = vmatpush.msrb.mxu0 %v249_v48  ;;  %224 = vmatpush.msra.mxu3 %v189_v16 }
  0x34   :  { %372 = vmatpush.msrb.mxu2 %v248_v50  ;;  %225 = vmatmul.f32.vlgmr.msra.gmra.mxu3 %v549_v31 }
  0x35   :  { %267 = vmatpush.msrb.mxu0 %v248_v50  ;;  %379 = vmatpush.msrb.mxu3 %v288_v17 }
  0x36   :  { %373 = vmatpush.msrb.mxu2 %v247_v53  ;;  %122 = vmatpush.msra.mxu1 %v91_v20 }
  0x37   :  { %268 = vmatpush.msrb.mxu0 %v247_v53  ;;  %123 = vmatmul.f32.vlgmr.msra.gmra.mxu1 %v549_v31 }
  0x38   :  { %374 = vmatpush.msrb.mxu2 %v246_v56  ;;  %320 = vmatpush.msrb.mxu1 %v288_v17 }
  0x39   :  { %181 = vmatmul.f32.gmra.mxu2 %v639_v57  ;;  %269 = vmatpush.msrb.mxu0 %v246_v56 }
  0x3a   :  { %375 = vmatpush.msrb.mxu2 %v245_v59  ;;  %82 = vmatmul.f32.gmra.mxu0 %v639_v57 }
  0x3b   :  { %270 = vmatpush.msrb.mxu0 %v245_v59  ;;  %380 = vmatpush.msrb.mxu3 %v287_v21 }
  0x3c   :  { %376 = vmatpush.msrb.mxu2 %v244_v61  ;;  %228 = vmatmul.f32.gmra.mxu3 %v571_v37 }
  0x3d   :  { %271 = vmatpush.msrb.mxu0 %v244_v61  ;;  %321 = vmatpush.msrb.mxu1 %v287_v21 }
  0x3e   :  { %377 = vmatpush.msrb.mxu2 %v243_v0 }
  0x3f   :  { %272 = vmatpush.msrb.mxu0 %v243_v0  ;;  %126 = vmatmul.f32.gmra.mxu1 %v571_v37 }
  0x40   :  { %378 = vmatpush.msrb.mxu2 %v242_v3 }
  0x41   :  { %280 = vmatmul.f32.vlgmr.msrb.gmra.mxu2 %v602_v46  ;;  %273 = vmatpush.msrb.mxu0 %v242_v3 }
  0x42   :  { %274 = vmatmul.f32.vlgmr.msrb.gmra.mxu0 %v549_v31 }
  0x44   :  { %231 = vmatmul.f32.gmra.mxu3 %v602_v46 }
  0x47   :  { %129 = vmatmul.f32.gmra.mxu1 %v602_v46 }
  0x49   :  { %283 = vmatmul.f32.gmra.mxu2 %v639_v57 }
  0x4a   :  { %277 = vmatmul.f32.gmra.mxu0 %v571_v37 }
  0x4c   :  { %234 = vmatmul.f32.gmra.mxu3 %v639_v57 }
  0x4f   :  { %132 = vmatmul.f32.gmra.mxu1 %v639_v57 }
  0x9f   :  { %v74_v22 = vpop.f32.mrf.mxu0 }
  0xa0   :  { %87 = vst.msk [vmem:[%s825_s9] sm:$0xff] %vm86_vm0, %v74_v22 }
  0xa4   :  { %v173_v23 = vpop.f32.mrf.mxu2 }
  0xa5   :  { %185 = vst [vmem:[%s826_s11] sm:$0xff] %v173_v23 }
  0xa7   :  { %v77_v24 = vpop.f32.mrf.mxu0 }
  0xa8   :  { %88 = vst.msk [vmem:[%s825_s9 + $0x8] sm:$0xff] %vm86_vm0, %v77_v24 }
  0xac   :  { %v176_v25 = vpop.f32.mrf.mxu2 }
  0xad   :  { %186 = vst [vmem:[%s826_s11 + $0x8] sm:$0xff] %v176_v25 }
  0xaf   :  { %v80_v26 = vpop.f32.mrf.mxu0 }
  0xb0   :  { %89 = vst.msk [vmem:[%s825_s9 + $0x10] sm:$0xff] %vm86_vm0, %v80_v26 }
  0xb4   :  { %v179_v27 = vpop.f32.mrf.mxu2  ;;  %v124_v35 = vpop.f32.mrf.mxu1 }
  0xb5   :  { %187 = vst [vmem:[%s826_s11 + $0x10] sm:$0xff] %v179_v27 }
  0xb6   :  { %136 = vst.msk [vmem:[%s828_s10] sm:$0xff] %vm86_vm0, %v124_v35 }
  0xb7   :  { %v83_v28 = vpop.f32.mrf.mxu0  ;;  %v226_v36 = vpop.f32.mrf.mxu3 }
  0xb8   :  { %90 = vst.msk [vmem:[%s825_s9 + $0x18] sm:$0xff] %vm86_vm0, %v83_v28  ;;  %v227_v37 = vadd.f32 %v381_v34, %v226_v36 }
  0xba   :  { %238 = vst [vmem:[%s829_s12] sm:$0xff] %v227_v37 }
  0xbc   :  { %v182_v29 = vpop.f32.mrf.mxu2  ;;  %v127_v38 = vpop.f32.mrf.mxu1 }
  0xbd   :  { %188 = vst [vmem:[%s826_s11 + $0x18] sm:$0xff] %v182_v29 }
  0xbe   :  { %137 = vst.msk [vmem:[%s828_s10 + $0x8] sm:$0xff] %vm86_vm0, %v127_v38 }
  0xbf   :  { %v275_v30 = vpop.f32.mrf.mxu0  ;;  %v229_v39 = vpop.f32.mrf.mxu3 }
  0xc0   :  { %359 = vmatmul.msk.f32.vlgmr.msrb.gmra.mxu1 %vm293_vm1, %v275_v30  ;;  %v230_v40 = vadd.f32 %v381_v34, %v229_v39 }
  0xc2   :  { %239 = vst [vmem:[%s829_s12 + $0x8] sm:$0xff] %v230_v40 }
  0xc4   :  { %v281_v31 = vpop.f32.mrf.mxu2  ;;  %v130_v41 = vpop.f32.mrf.mxu1 }
  0xc5   :  { %361 = vmatmul.msk.f32.vlgmr.msrb.gmra.mxu3 %vm293_vm1, %v281_v31  ;;  %138 = vst.msk [vmem:[%s828_s10 + $0x10] sm:$0xff] %vm86_vm0, %v130_v41 }
  0xc7   :  { %v278_v32 = vpop.f32.mrf.mxu0  ;;  %v232_v42 = vpop.f32.mrf.mxu3 }
  0xc8   :  { %360 = vmatmul.msk.f32.gmra.mxu1 %vm293_vm1, %v278_v32  ;;  %v233_v43 = vadd.f32 %v381_v34, %v232_v42 }
  0xca   :  { %240 = vst [vmem:[%s829_s12 + $0x10] sm:$0xff] %v233_v43 }
  0xcc   :  { %v284_v33 = vpop.f32.mrf.mxu2  ;;  %v133_v44 = vpop.f32.mrf.mxu1 }
  0xcd   :  { %362 = vmatmul.msk.f32.gmra.mxu3 %vm293_vm1, %v284_v33  ;;  %139 = vst.msk [vmem:[%s828_s10 + $0x18] sm:$0xff] %vm86_vm0, %v133_v44 }
  0xcf   :  { %v235_v45 = vpop.f32.mrf.mxu3 }
  0xd0   :  { %v236_v46 = vadd.f32 %v381_v34, %v235_v45 }
  0xd2   :  { %241 = vst [vmem:[%s829_s12 + $0x18] sm:$0xff] %v236_v46 }
 0x13d   :  { %v323_v48 = vpop.f32.mrf.mxu1 }
 0x13e   :  { %v324_v49 = vadd.f32 %v382_v47, %v323_v48 }
 0x140   :  { %335 = vst.msk [vmem:[%s830_s13] sm:$0xff] %vm86_vm0, %v324_v49 }
 0x145   :  { %v326_v50 = vpop.f32.mrf.mxu1 }
 0x146   :  { %v327_v51 = vadd.f32 %v382_v47, %v326_v50 }
 0x148   :  { %v329_v52 = vpop.f32.mrf.mxu3  ;;  %336 = vst.msk [vmem:[%s830_s13 + $0x8] sm:$0xff] %vm86_vm0, %v327_v51 }
 0x149   :  { %v330_v53 = vadd.f32 %v382_v47, %v329_v52 }
 0x14b   :  { %337 = vst.msk [vmem:[%s830_s13 + $0x10] sm:$0xff] %vm86_vm0, %v330_v53 }
 0x150   :  { %v332_v54 = vpop.f32.mrf.mxu3 }
 0x151   :  { %v333_v55 = vadd.f32 %v382_v47, %v332_v54 }
 0x153   :  { %338 = vst.msk [vmem:[%s830_s13 + $0x18] sm:$0xff] %vm86_vm0, %v333_v55 }

// kernel: gla_forward.5
= control target key start
LH: loop header
LB: loop body
LE: loop exit
PB: predicated region body
PF: predicated region fallthrough
CT: control target
= control target key end

     0   :  { %s477_s0 = inlined_call_operand.vmem [shape: f32[32,128], index: 0, kind: input, shape index: {}]   ;;  %s478_s1 = inlined_call_operand.vmem [shape: f32[32,128], index: 1, kind: input, shape index: {}]   ;;  %s479_s2 = inlined_call_operand.vmem [shape: f32[128,128], index: 2, kind: input, shape index: {}]   ;;  %s480_s3 = inlined_call_operand.hbm [shape: f32[32,128], index: 3, kind: output, shape index: {}]  }
   0x1   :  { %v122_v0 = vld [vmem:[%s479_s2 + $0x78] sm:$0xff]  ;;  %v121_v1 = vld [vmem:[%s479_s2 + $0x70] sm:$0xff]  ;;  %v120_v2 = vld [vmem:[%s479_s2 + $0x68] sm:$0xff] }
   0x2   :  { %179 = vmatpush.msra.mxu2 %v122_v0  ;;  %180 = vmatpush.msra.mxu3 %v122_v0  ;;  %v119_v3 = vld [vmem:[%s479_s2 + $0x60] sm:$0xff]  ;;  %v309_v4 = vld [vmem:[%s477_s0 + $0x10] sm:$0xff]  ;;  %v118_v5 = vld [vmem:[%s479_s2 + $0x58] sm:$0xff] }
   0x3   :  { %123 = vmatpush.msra.mxu0 %v122_v0  ;;  %178 = vmatpush.msra.mxu1 %v122_v0  ;;  %v176_v6 = vmul.f32 -1.442695, %v309_v4  ;;  %v318_v7 = vld [vmem:[%s477_s0 + $0x18] sm:$0xff]  ;;  %v323_v8 = vld [vmem:[%s477_s0] sm:$0xff]  ;;  %v330_v11 = vld [vmem:[%s477_s0 + $0x8] sm:$0xff] }
   0x4   :  { %182 = vmatpush.msra.mxu2 %v121_v1  ;;  %183 = vmatpush.msra.mxu3 %v121_v1  ;;  %v177_v9 = vmul.f32 -1.442695, %v318_v7  ;;  %v174_v10 = vmul.f32 -1.442695, %v323_v8  ;;  %v117_v12 = vld [vmem:[%s479_s2 + $0x50] sm:$0xff] }
   0x5   :  { %124 = vmatpush.msra.mxu0 %v121_v1  ;;  %181 = vmatpush.msra.mxu1 %v121_v1  ;;  %229 = vpow2.f32 %v176_v6  ;;  %v175_v13 = vmul.f32 -1.442695, %v330_v11 }
   0x6   :  { %185 = vmatpush.msra.mxu2 %v120_v2  ;;  %186 = vmatpush.msra.mxu3 %v120_v2 }
   0x7   :  { %125 = vmatpush.msra.mxu0 %v120_v2  ;;  %184 = vmatpush.msra.mxu1 %v120_v2 }
   0x8   :  { %188 = vmatpush.msra.mxu2 %v119_v3  ;;  %189 = vmatpush.msra.mxu3 %v119_v3 }
   0x9   :  { %126 = vmatpush.msra.mxu0 %v119_v3  ;;  %187 = vmatpush.msra.mxu1 %v119_v3 }
   0xa   :  { %8 = vsyncpa [#allocation3], 0  ;;  %191 = vmatpush.msra.mxu2 %v118_v5  ;;  %192 = vmatpush.msra.mxu3 %v118_v5  ;;  %231 = vpow2.f32 %v177_v9  ;;  %v116_v14 = vld [vmem:[%s479_s2 + $0x48] sm:$0xff]  ;;  %v115_v15 = vld [vmem:[%s479_s2 + $0x40] sm:$0xff]  ;;  %s271_s4 = smov [#allocation2]   ;;  %s162_s7 = sshll.u32 %s480_s3, 4  ;;  %s163_s7 = int_to_ptr.hbm [resolvable:$true] %s162_s7 }
   0xb   :  { %127 = vmatpush.msra.mxu0 %v118_v5  ;;  %190 = vmatpush.msra.mxu1 %v118_v5  ;;  %233 = vpow2.f32 %v174_v10  ;;  %v230_v16 = vpop.eup %229  ;;  %v114_v17 = vld [vmem:[%s479_s2 + $0x38] sm:$0xff]  ;;  %v113_v21 = vld [vmem:[%s479_s2 + $0x30] sm:$0xff]  ;;  %v112_v24 = vld [vmem:[%s479_s2 + $0x28] sm:$0xff]  ;;  %s160_s5 = sshll.u32 %s271_s4, 4  ;;  %s273_s8 = smov 8   ;;  %s161_s5 = int_to_ptr.vmem [resolvable:$true] %s160_s5 }
   0xc   :  { %194 = vmatpush.msra.mxu2 %v117_v12  ;;  %195 = vmatpush.msra.mxu3 %v117_v12  ;;  %235 = vpow2.f32 %v175_v13  ;;  %v345_v19 = vadd.f32 1.0, %v230_v16  ;;  %v111_v27 = vld [vmem:[%s479_s2 + $0x20] sm:$0xff]  ;;  %v110_v28 = vld [vmem:[%s479_s2 + $0x18] sm:$0xff]  ;;  %v109_v35 = vld [vmem:[%s479_s2 + $0x10] sm:$0xff] }
   0xd   :  { %128 = vmatpush.msra.mxu0 %v117_v12  ;;  %193 = vmatpush.msra.mxu1 %v117_v12  ;;  %v108_v38 = vld [vmem:[%s479_s2 + $0x8] sm:$0xff]  ;;  %v107_v47 = vld [vmem:[%s479_s2] sm:$0xff]  ;;  %v101_v2 = vld [vmem:[%s478_s1 + $0x10] sm:$0xff] }
   0xe   :  { %197 = vmatpush.msra.mxu2 %v116_v14  ;;  %198 = vmatpush.msra.mxu3 %v116_v14  ;;  %237 = vrcp.f32 %v345_v19  ;;  %v74_v29 = vand.u32 2147483647, %v345_v19  ;;  %v76_v30 = vand.u32 2147483648, %v345_v19  ;;  %vm70_vm0 = vweird.f32 %v345_v19  ;;  %v102_v13 = vld [vmem:[%s478_s1 + $0x18] sm:$0xff] }
   0xf   :  { %129 = vmatpush.msra.mxu0 %v116_v14  ;;  %196 = vmatpush.msra.mxu1 %v116_v14 }
  0x10   :  { %v232_v18 = vpop.eup %231  ;;  %200 = vmatpush.msra.mxu2 %v115_v15  ;;  %201 = vmatpush.msra.mxu3 %v115_v15  ;;  %vm390_vm3 = vcmp.eq.f32.partialorder %v74_v29, 8.507059e+37  ;;  %v77_v41 = vor.u32 1.1754944e-38, %v76_v30 }
  0x11   :  { %v234_v20 = vpop.eup %233  ;;  %130 = vmatpush.msra.mxu0 %v115_v15  ;;  %199 = vmatpush.msra.mxu1 %v115_v15  ;;  %v350_v22 = vadd.f32 1.0, %v232_v18 }
  0x12   :  { %v236_v23 = vpop.eup %235  ;;  %203 = vmatpush.msra.mxu2 %v114_v17  ;;  %204 = vmatpush.msra.mxu3 %v114_v17  ;;  %v357_v25 = vadd.f32 1.0, %v234_v20 }
  0x13   :  { %131 = vmatpush.msra.mxu0 %v114_v17  ;;  %202 = vmatpush.msra.mxu1 %v114_v17  ;;  %239 = vrcp.f32 %v350_v22  ;;  %v359_v26 = vadd.f32 1.0, %v236_v23  ;;  %v89_v32 = vand.u32 2147483647, %v350_v22  ;;  %v91_v33 = vand.u32 2147483648, %v350_v22 }
  0x14   :  { %206 = vmatpush.msra.mxu2 %v113_v21  ;;  %207 = vmatpush.msra.mxu3 %v113_v21  ;;  %241 = vrcp.f32 %v357_v25  ;;  %v371_v31 = vpop.eup %237  ;;  %vm85_vm1 = vweird.f32 %v350_v22  ;;  %vm40_vm6 = vweird.f32 %v357_v25  ;;  %v44_v50 = vand.u32 2147483647, %v357_v25 }
  0x15   :  { %132 = vmatpush.msra.mxu0 %v113_v21  ;;  %205 = vmatpush.msra.mxu1 %v113_v21  ;;  %243 = vrcp.f32 %v359_v26  ;;  %v66_v36 = vmul.f32 %v371_v31, %v345_v19  ;;  %vm71_vm2 = vweird.f32 %v371_v31  ;;  %vm395_vm5 = vcmp.eq.f32.partialorder %v89_v32, 8.507059e+37  ;;  %v99_v21 = vld [vmem:[%s478_s1] sm:$0xff] }
  0x16   :  { %209 = vmatpush.msra.mxu2 %v112_v24  ;;  %210 = vmatpush.msra.mxu3 %v112_v24  ;;  %v92_v45 = vor.u32 1.1754944e-38, %v91_v33  ;;  %vm410_vm7 = vmor %vm70_vm0, %vm71_vm2  ;;  %v46_v53 = vand.u32 2147483648, %v357_v25  ;;  %vm55_vm8 = vweird.f32 %v359_v26  ;;  %v61_v58 = vand.u32 2147483648, %v359_v26 }
  0x17   :  { %133 = vmatpush.msra.mxu0 %v112_v24  ;;  %208 = vmatpush.msra.mxu1 %v112_v24  ;;  %v67_v39 = vsub.f32 1.0, %v66_v36  ;;  %v59_v61 = vand.u32 2147483647, %v359_v26  ;;  %vm433_vm12 = vcmp.eq.f32.partialorder %v44_v50, 8.507059e+37 }
  0x18   :  { %212 = vmatpush.msra.mxu2 %v111_v27  ;;  %213 = vmatpush.msra.mxu3 %v111_v27  ;;  %v47_v6 = vor.u32 1.1754944e-38, %v46_v53  ;;  %v62_v15 = vor.u32 1.1754944e-38, %v61_v58 }
  0x19   :  { %v375_v34 = vpop.eup %239  ;;  %134 = vmatpush.msra.mxu0 %v111_v27  ;;  %211 = vmatpush.msra.mxu1 %v111_v27  ;;  %v68_v48 = vmul.f32 %v371_v31, %v67_v39  ;;  %vm60_vm15 = vcmp.eq.f32.partialorder %v59_v61, 8.507059e+37 }
  0x1a   :  { %215 = vmatpush.msra.mxu2 %v110_v28  ;;  %216 = vmatpush.msra.mxu3 %v110_v28  ;;  %v81_v37 = vmul.f32 %v375_v34, %v350_v22  ;;  %v242_v42 = vpop.eup %241  ;;  %vm86_vm4 = vweird.f32 %v375_v34 }
  0x1b   :  { %135 = vmatpush.msra.mxu0 %v110_v28  ;;  %214 = vmatpush.msra.mxu1 %v110_v28  ;;  %v244_v46 = vpop.eup %243  ;;  %v36_v49 = vmul.f32 %v242_v42, %v357_v25  ;;  %v69_v55 = vadd.f32 %v371_v31, %v68_v48  ;;  %vm423_vm9 = vmor %vm85_vm1, %vm86_vm4  ;;  %vm41_vm10 = vweird.f32 %v242_v42 }
  0x1c   :  { %218 = vmatpush.msra.mxu2 %v109_v35  ;;  %219 = vmatpush.msra.mxu3 %v109_v35  ;;  %v82_v43 = vsub.f32 1.0, %v81_v37  ;;  %v51_v54 = vmul.f32 %v244_v46, %v359_v26  ;;  %vm56_vm11 = vweird.f32 %v244_v46  ;;  %vm448_vm13 = vmor %vm40_vm6, %vm41_vm10 }
  0x1d   :  { %136 = vmatpush.msra.mxu0 %v109_v35  ;;  %217 = vmatpush.msra.mxu1 %v109_v35  ;;  %v37_v57 = vsub.f32 1.0, %v36_v49  ;;  %v73_v62 = vsel %vm410_vm7, %v371_v31, %v69_v55  ;;  %vm57_vm14 = vmor %vm55_vm8, %vm56_vm11 }
  0x1e   :  { %221 = vmatpush.msra.mxu2 %v108_v38  ;;  %222 = vmatpush.msra.mxu3 %v108_v38  ;;  %v83_v52 = vmul.f32 %v375_v34, %v82_v43  ;;  %v52_v60 = vsub.f32 1.0, %v51_v54  ;;  %v78_v1 = vsel %vm390_vm3, %v77_v41, %v73_v62 }
  0x1f   :  { %137 = vmatpush.msra.mxu0 %v108_v38  ;;  %220 = vmatpush.msra.mxu1 %v108_v38  ;;  %v38_v63 = vmul.f32 %v242_v42, %v37_v57  ;;  %v97_v10 = vmul.f32 %v78_v1, %v309_v4 }
  0x20   :  { %224 = vmatpush.msra.mxu2 %v107_v47  ;;  %225 = vmatpush.msra.mxu3 %v107_v47  ;;  %v84_v59 = vadd.f32 %v375_v34, %v83_v52  ;;  %v53_v9 = vmul.f32 %v244_v46, %v52_v60 }
  0x21   :  { %138 = vmatpush.msra.mxu0 %v107_v47  ;;  %223 = vmatpush.msra.mxu1 %v107_v47  ;;  %v39_v14 = vadd.f32 %v242_v42, %v38_v63  ;;  %v105_v18 = vmul.f32 %v101_v2, %v97_v10 }
  0x22   :  { %v88_v3 = vsel %vm423_vm9, %v375_v34, %v84_v59  ;;  %v54_v17 = vadd.f32 %v244_v46, %v53_v9 }
  0x23   :  { %v93_v12 = vsel %vm395_vm5, %v92_v45, %v88_v3  ;;  %v43_v4 = vsel %vm448_vm13, %v242_v42, %v39_v14  ;;  %145 = vmatmul.f32.vlgmr.msra.gmra.mxu2 %v105_v18 }
  0x24   :  { %v98_v16 = vmul.f32 %v93_v12, %v318_v7  ;;  %v48_v20 = vsel %vm433_vm12, %v47_v6, %v43_v4  ;;  %v58_v22 = vsel %vm57_vm14, %v244_v46, %v54_v17  ;;  %v100_v7 = vld [vmem:[%s478_s1 + $0x8] sm:$0xff]  ;;  %s272_s1 = smov 128  }
  0x25   :  { %v95_v23 = vmul.f32 %v48_v20, %v323_v8  ;;  %v63_v24 = vsel %vm60_vm15, %v62_v15, %v58_v22 }
  0x26   :  { %v106_v19 = vmul.f32 %v102_v13, %v98_v16  ;;  %v96_v25 = vmul.f32 %v63_v24, %v330_v11 }
  0x27   :  { %v103_v26 = vmul.f32 %v99_v21, %v95_v23 }
  0x28   :  { %148 = vmatmul.f32.vlgmr.msra.gmra.mxu3 %v106_v19  ;;  %v104_v27 = vmul.f32 %v100_v7, %v96_v25 }
  0x29   :  { %139 = vmatmul.f32.vlgmr.msra.gmra.mxu0 %v103_v26 }
  0x2a   :  { %142 = vmatmul.f32.vlgmr.msra.gmra.mxu1 %v104_v27 }
  0xa6   :  { %v140_v28 = vpop.f32.mrf.mxu0  ;;  %v146_v29 = vpop.f32.mrf.mxu2 }
  0xa7   :  { %152 = vst [vmem:[#allocation2] sm:$0xff] %v140_v28  ;;  %v143_v8 = vpop.f32.mrf.mxu1 }
  0xa8   :  { %153 = vst [vmem:[#allocation2 + $0x8] sm:$0xff] %v143_v8 }
  0xa9   :  { %154 = vst [vmem:[#allocation2 + $0x10] sm:$0xff] %v146_v29 }
  0xab   :  { %v149_v30 = vpop.f32.mrf.mxu3 }
  0xac   :  { %155 = vst [vmem:[#allocation2 + $0x18] sm:$0xff] %v149_v30 }
  0xad   :  { %168 = dma.vmem_to_hbm [thread:$0]  %s161_s5, 512, %s163_s7, [#allocation3], %s272_s1, %s272_s1, %s273_s8  }
  0xae   :  { %269 = dma.done.wait [#allocation3], 512  }
  0xaf   :  { %270 = vsyncadd [#allocation3], 4294966784 }
  0xb0   :  { %173 = vsyncpa [#allocation3], 1 }

</bundles_post_ra>
